<compile_context>
chip_gen: v7x
topology: tpu7x:2x2x1
jax: 0.10.0
libtpu: 0.0.40
codegen_flags: <defaults>
</compile_context>

<pallas_src>
import jax
import jax.numpy as jnp
from jax.experimental import pallas as pl
from jax.experimental.pallas import tpu as pltpu

_INV_SQRT2 = 0.7071067811865476


def _make_safm_kernel(H, W, dim, n_levels):
    cc = dim // n_levels
    HW = H * W

    # Lane-chunk width for the epilogue (bounds live values; static offsets).
    lc = HW
    for cand in (2048, 1024, 512, 256):
        if HW > cand and HW % cand == 0:
            lc = cand
            break

    def kernel(xy_ref, x_ref, dww_ref, dwb_ref, aggw_ref, aggb_ref, out_ref):
        # xy_ref  : (2, HW) int32 — row 0: x (W coord), row 1: y (H coord)
        # x_ref   : (dim, HW) input block,  out_ref : (dim, HW) output block
        # dww_ref : (n_levels, 9, cc, 1) depthwise 3x3 weights (t = ky*3 + kx)
        # dwb_ref : (n_levels, cc, 1)    depthwise biases
        # aggw_ref: (dim, dim) 1x1 conv weight, aggb_ref: (dim, 1) bias
        x_col = xy_ref[0:1, :]                       # (1, HW), hoisted
        y_row = xy_ref[1:2, :]

        for i in range(n_levels):
            k = 2 ** i

            # ---- channel chunk i -------------------------------------------
            pooled = x_ref[i * cc:(i + 1) * cc, :].astype(jnp.float32)

            # ---- k x k max pool, kept block-constant at full resolution -----
            # Butterfly sweep; wrapped lanes of a roll are never selected
            # because pooling blocks are aligned to k.  Nearest-upsampling
            # later is therefore implicit.
            step = 1
            while step < k:
                # H direction: partner row y +- step
                nb_p = pltpu.roll(pooled, HW - step * W, axis=1)   # row y+step
                nb_m = pltpu.roll(pooled, step * W, axis=1)        # row y-step
                take_p = (y_row & step) == 0
                pooled = jnp.maximum(pooled, jnp.where(take_p, nb_p, nb_m))
                # W direction: partner column x +- step
                nb_p = pltpu.roll(pooled, HW - step, axis=1)       # col x+step
                nb_m = pltpu.roll(pooled, step, axis=1)            # col x-step
                take_p = (x_col & step) == 0
                pooled = jnp.maximum(pooled, jnp.where(take_p, nb_p, nb_m))
                step *= 2
            # pooled[c, y*W + x] == maxpool_kxk(chunk)[c, y//k, x//k]

            # ---- depthwise 3x3 conv (stride 1, pad 1 at pooled resolution) --
            # H-shifted rows: 2 masked rolls by +-k*W.
            top_ok = y_row >= k                        # row y-k exists
            bot_ok = y_row < (H - k)                   # row y+k exists
            row_m = jnp.where(top_ok, pltpu.roll(pooled, k * W, axis=1), 0.0)
            row_p = jnp.where(bot_ok, pltpu.roll(pooled, HW - k * W, axis=1), 0.0)

            # Per-kx column sums over ky (tap index t = ky*3 + kx).
            col_m = (dww_ref[i, 0] * row_m + dww_ref[i, 3] * pooled
                     + dww_ref[i, 6] * row_p)
            col_c = (dww_ref[i, 1] * row_m + dww_ref[i, 4] * pooled
                     + dww_ref[i, 7] * row_p)
            col_p = (dww_ref[i, 2] * row_m + dww_ref[i, 5] * pooled
                     + dww_ref[i, 8] * row_p)

            left_ok = x_col >= k                       # col x-k exists
            right_ok = x_col < (W - k)                 # col x+k exists
            s = (dwb_ref[i] + col_c
                 + jnp.where(left_ok, pltpu.roll(col_m, k, axis=1), 0.0)
                 + jnp.where(right_ok, pltpu.roll(col_p, HW - k, axis=1), 0.0))
            # s : (cc, HW) — this level's slice of torch.cat(out, dim=1),
            # already nearest-upsampled in both directions (block-constant).

            # ---- fold straight into the 1x1 aggr conv -----------------------
            # Single (dim, cc) @ (cc, HW) matmul with a big lane-dense N,
            # accumulated (f32) into the resident output block; no cat scratch,
            # no broadcast weight.
            w_i = aggw_ref[:, i * cc:(i + 1) * cc]     # (dim, cc)
            contrib = jnp.dot(w_i, s, preferred_element_type=jnp.float32)
            if i == 0:
                out_ref[...] = contrib + aggb_ref[...]
            else:
                out_ref[...] = out_ref[...] + contrib

        # ---- GELU (exact erf = PyTorch nn.GELU default) * x gating ----------
        # NOTE: jax.nn.gelu(pre, approximate=True) would move this onto the EUP
        # (perf review suggestion) at a small numerics delta; exact erf is kept
        # for parity with the reference module.
        for c0 in range(0, HW, lc):
            pre = out_ref[:, c0:c0 + lc]
            gelu = 0.5 * pre * (1.0 + jax.lax.erf(pre * _INV_SQRT2))
            out_ref[:, c0:c0 + lc] = (
                gelu * x_ref[:, c0:c0 + lc].astype(jnp.float32)
            ).astype(out_ref.dtype)

    return kernel


def safm_forward(x_nchw, dww, dwb, aggw, aggb, n_levels=4):
    """x_nchw: (N, C, H, W) float32. Params:
       dww  (n_levels, 9, C//n_levels, 1)  depthwise 3x3 weights (t = ky*3+kx)
       dwb  (n_levels, C//n_levels, 1)     depthwise biases
       aggw (C, C)                         1x1 conv weight (c_out, c_in)
       aggb (C, 1)                         1x1 conv bias
    Returns (N, C, H, W)."""
    N, C, H, W = x_nchw.shape
    assert C % n_levels == 0
    K = 2 ** (n_levels - 1)
    assert H % K == 0 and W % K == 0, "adaptive pool assumed uniform"
    cc = C // n_levels
    HW = H * W

    x_flat = x_nchw.astype(jnp.float32).reshape(N, C, HW)   # free reshape

    # Spatial coordinates of every lane of the flattened axis, precomputed on
    # the host side so the kernel needs no vector integer div/mod.
    ys = jnp.repeat(jnp.arange(H, dtype=jnp.int32), W)
    xs = jnp.tile(jnp.arange(W, dtype=jnp.int32), H)
    xy = jnp.stack([xs, ys], axis=0)                         # (2, HW) int32

    kernel = _make_safm_kernel(H, W, C, n_levels)

    # Derive the VMEM budget from the block size instead of hardcoding 64 MiB
    # (v6e/v5e can go higher; v7x only has 64 MiB — see TODO about tiling).
    block_bytes = C * HW * 4
    vmem_limit = int(min(max(6 * block_bytes + (4 << 20), 16 << 20), 100 << 20))

    out_flat = pl.pallas_call(
        kernel,
        out_shape=jax.ShapeDtypeStruct((N, C, HW), jnp.float32),
        grid_spec=pltpu.PrefetchScalarGridSpec(
            num_scalar_prefetch=0,
            grid=(N,),
            in_specs=[
                pl.BlockSpec((2, HW), lambda b: (0, 0)),
                pl.BlockSpec((None, C, HW), lambda b: (b, 0, 0)),
                pl.BlockSpec((n_levels, 9, cc, 1), lambda b: (0, 0, 0, 0)),
                pl.BlockSpec((n_levels, cc, 1), lambda b: (0, 0, 0)),
                pl.BlockSpec((C, C), lambda b: (0, 0)),
                pl.BlockSpec((C, 1), lambda b: (0, 0)),
            ],
            out_specs=pl.BlockSpec((None, C, HW), lambda b: (b, 0, 0)),
        ),
        compiler_params=pltpu.CompilerParams(
            dimension_semantics=("parallel",),
            vmem_limit_bytes=vmem_limit),
    )(xy, x_flat, dww, dwb, aggw, aggb)

    return out_flat.reshape(N, C, H, W)


def safm_reference(x_nchw, dww, dwb, aggw, aggb, n_levels=4):
    """Plain-JAX reference mirroring the PyTorch forward (for validation)."""
    N, C, H, W = x_nchw.shape
    cc = C // n_levels
    outs = []
    for i in range(n_levels):
        k = 2 ** i
        xi = x_nchw[:, i * cc:(i + 1) * cc]
        if k > 1:
            xp = xi.reshape(N, cc, H // k, k, W // k, k).max(axis=(3, 5))
        else:
            xp = xi
        Hp, Wp = xp.shape[-2:]
        padded = jnp.pad(xp, ((0, 0), (0, 0), (1, 1), (1, 1)))
        s = jnp.zeros_like(xp) + dwb[i].reshape(1, cc, 1, 1)
        for ky in range(3):
            for kx in range(3):
                t = ky * 3 + kx
                s = s + dww[i, t].reshape(1, cc, 1, 1) \
                    * padded[:, :, ky:ky + Hp, kx:kx + Wp]
        if k > 1:
            s = jnp.repeat(jnp.repeat(s, k, axis=2), k, axis=3)
        outs.append(s)
    cat = jnp.concatenate(outs, axis=1)
    y = jnp.einsum('oc,nchw->nohw', aggw, cat,
                   precision=jax.lax.Precision.HIGHEST) + aggb.reshape(1, C, 1, 1)
    y = 0.5 * y * (1.0 + jax.lax.erf(y * _INV_SQRT2))
    return y * x_nchw


if __name__ == "__main__":
    n_levels = 4
    N, dim, H, W = 2, 16, 16, 16          # dim % n_levels == 0; H, W % 8 == 0
    cc = dim // n_levels

    key = jax.random.PRNGKey(0)
    k1, k2, k3, k4, k5 = jax.random.split(key, 5)
    x = jax.random.normal(k1, (N, dim, H, W), dtype=jnp.float32)
    dww = 0.15 * jax.random.normal(k2, (n_levels, 9, cc, 1), dtype=jnp.float32)
    dwb = 0.10 * jax.random.normal(k3, (n_levels, cc, 1), dtype=jnp.float32)
    aggw = 0.10 * jax.random.normal(k4, (dim, dim), dtype=jnp.float32)
    aggb = 0.10 * jax.random.normal(k5, (dim, 1), dtype=jnp.float32)

    out = safm_forward(x, dww, dwb, aggw, aggb, n_levels=n_levels)
    out = jax.block_until_ready(out)

    ref = safm_reference(x, dww, dwb, aggw, aggb, n_levels=n_levels)
    max_err = float(jnp.max(jnp.abs(out - ref)))
    # Accepted accuracy: the in-kernel aggr matmul runs at the MXU's default
    # precision (routes through bf16 passes) while the reference einsum uses
    # HIGHEST, so a loose absolute tolerance is used deliberately.
    if max_err > 5e-2:
        raise RuntimeError(f"Pallas kernel mismatch vs reference: {max_err}")

    print("KERNEL_OK")
</pallas_src>

<mosaic_0001>
module attributes {stable_mosaic.version = 11 : i64} {
  func.func @kernel(%arg0: i32, %arg1: memref<2x256xi32, #tpu.memory_space<vmem>>, %arg2: memref<1x16x256xf32, #tpu.memory_space<vmem>>, %arg3: memref<4x9x4x1xf32, #tpu.memory_space<vmem>>, %arg4: memref<4x4x1xf32, #tpu.memory_space<vmem>>, %arg5: memref<16x16xf32, #tpu.memory_space<vmem>>, %arg6: memref<16x1xf32, #tpu.memory_space<vmem>>, %arg7: memref<1x16x256xf32, #tpu.memory_space<vmem>>) attributes {dimension_semantics = [#tpu.dimension_semantics<parallel>], iteration_bounds = array<i64: 2>, scalar_prefetch = 0 : i64, scratch_operands = 0 : i64, tpu.core_type = #tpu.core_type<tc>, window_params = [{pipeline_mode = #tpu.pipeline_mode<synchronous>, transform_indices = @transform_0, window_bounds = array<i64: 2, 256>}, {transform_indices = @transform_1, window_bounds = array<i64: 1, 16, 256>}, {pipeline_mode = #tpu.pipeline_mode<synchronous>, transform_indices = @transform_2, window_bounds = array<i64: 4, 9, 4, 1>}, {pipeline_mode = #tpu.pipeline_mode<synchronous>, transform_indices = @transform_3, window_bounds = array<i64: 4, 4, 1>}, {pipeline_mode = #tpu.pipeline_mode<synchronous>, transform_indices = @transform_4, window_bounds = array<i64: 16, 16>}, {pipeline_mode = #tpu.pipeline_mode<synchronous>, transform_indices = @transform_5, window_bounds = array<i64: 16, 1>}, {transform_indices = @transform_6, window_bounds = array<i64: 1, 16, 256>}]} {
    %c0 = arith.constant 0 : index
    %c0_0 = arith.constant 0 : index
    %0 = vector.load %arg1[%c0, %c0_0] : memref<2x256xi32, #tpu.memory_space<vmem>>, vector<1x256xi32>
    %c1 = arith.constant 1 : index
    %c0_1 = arith.constant 0 : index
    %1 = vector.load %arg1[%c1, %c0_1] : memref<2x256xi32, #tpu.memory_space<vmem>>, vector<1x256xi32>
    %c0_2 = arith.constant 0 : index
    %c0_3 = arith.constant 0 : index
    %c0_4 = arith.constant 0 : index
    %2 = vector.load %arg2[%c0_2, %c0_3, %c0_4] : memref<1x16x256xf32, #tpu.memory_space<vmem>>, vector<1x4x256xf32>
    %3 = vector.shape_cast %2 : vector<1x4x256xf32> to vector<4x256xf32>
    %c1_i32 = arith.constant 1 : i32
    %4 = vector.broadcast %c1_i32 : i32 to vector<1x256xi32>
    %5 = arith.cmpi sge, %1, %4 : vector<1x256xi32>
    %c15_i32 = arith.constant 15 : i32
    %6 = vector.broadcast %c15_i32 : i32 to vector<1x256xi32>
    %7 = arith.cmpi slt, %1, %6 : vector<1x256xi32>
    %c16_i32 = arith.constant 16 : i32
    %8 = tpu.dynamic_rotate %3 by %c16_i32 dim 1 : vector<4x256xf32>, i32 -> vector<4x256xf32>
    %cst = arith.constant 0.000000e+00 : f32
    %9 = vector.shape_cast %5 : vector<1x256xi1> to vector<1x256xi1>
    %10 = vector.broadcast %9 : vector<1x256xi1> to vector<4x256xi1>
    %11 = vector.broadcast %cst : f32 to vector<4x256xf32>
    %12 = arith.select %10, %8, %11 : vector<4x256xi1>, vector<4x256xf32>
    %c240_i32 = arith.constant 240 : i32
    %13 = tpu.dynamic_rotate %3 by %c240_i32 dim 1 : vector<4x256xf32>, i32 -> vector<4x256xf32>
    %cst_5 = arith.constant 0.000000e+00 : f32
    %14 = vector.shape_cast %7 : vector<1x256xi1> to vector<1x256xi1>
    %15 = vector.broadcast %14 : vector<1x256xi1> to vector<4x256xi1>
    %16 = vector.broadcast %cst_5 : f32 to vector<4x256xf32>
    %17 = arith.select %15, %13, %16 : vector<4x256xi1>, vector<4x256xf32>
    %c0_6 = arith.constant 0 : index
    %c0_7 = arith.constant 0 : index
    %c0_8 = arith.constant 0 : index
    %c0_9 = arith.constant 0 : index
    %18 = vector.load %arg3[%c0_6, %c0_7, %c0_8, %c0_9] : memref<4x9x4x1xf32, #tpu.memory_space<vmem>>, vector<1x1x4x1xf32>
    %19 = vector.shape_cast %18 : vector<1x1x4x1xf32> to vector<4x1xf32>
    %20 = vector.broadcast %19 : vector<4x1xf32> to vector<4x256xf32>
    %21 = arith.mulf %20, %12 : vector<4x256xf32>
    %c0_10 = arith.constant 0 : index
    %c3 = arith.constant 3 : index
    %c0_11 = arith.constant 0 : index
    %c0_12 = arith.constant 0 : index
    %22 = vector.load %arg3[%c0_10, %c3, %c0_11, %c0_12] : memref<4x9x4x1xf32, #tpu.memory_space<vmem>>, vector<1x1x4x1xf32>
    %23 = vector.shape_cast %22 : vector<1x1x4x1xf32> to vector<4x1xf32>
    %24 = vector.broadcast %23 : vector<4x1xf32> to vector<4x256xf32>
    %25 = arith.mulf %24, %3 : vector<4x256xf32>
    %26 = arith.addf %21, %25 : vector<4x256xf32>
    %c0_13 = arith.constant 0 : index
    %c6 = arith.constant 6 : index
    %c0_14 = arith.constant 0 : index
    %c0_15 = arith.constant 0 : index
    %27 = vector.load %arg3[%c0_13, %c6, %c0_14, %c0_15] : memref<4x9x4x1xf32, #tpu.memory_space<vmem>>, vector<1x1x4x1xf32>
    %28 = vector.shape_cast %27 : vector<1x1x4x1xf32> to vector<4x1xf32>
    %29 = vector.broadcast %28 : vector<4x1xf32> to vector<4x256xf32>
    %30 = arith.mulf %29, %17 : vector<4x256xf32>
    %31 = arith.addf %26, %30 : vector<4x256xf32>
    %c0_16 = arith.constant 0 : index
    %c1_17 = arith.constant 1 : index
    %c0_18 = arith.constant 0 : index
    %c0_19 = arith.constant 0 : index
    %32 = vector.load %arg3[%c0_16, %c1_17, %c0_18, %c0_19] : memref<4x9x4x1xf32, #tpu.memory_space<vmem>>, vector<1x1x4x1xf32>
    %33 = vector.shape_cast %32 : vector<1x1x4x1xf32> to vector<4x1xf32>
    %34 = vector.broadcast %33 : vector<4x1xf32> to vector<4x256xf32>
    %35 = arith.mulf %34, %12 : vector<4x256xf32>
    %c0_20 = arith.constant 0 : index
    %c4 = arith.constant 4 : index
    %c0_21 = arith.constant 0 : index
    %c0_22 = arith.constant 0 : index
    %36 = vector.load %arg3[%c0_20, %c4, %c0_21, %c0_22] : memref<4x9x4x1xf32, #tpu.memory_space<vmem>>, vector<1x1x4x1xf32>
    %37 = vector.shape_cast %36 : vector<1x1x4x1xf32> to vector<4x1xf32>
    %38 = vector.broadcast %37 : vector<4x1xf32> to vector<4x256xf32>
    %39 = arith.mulf %38, %3 : vector<4x256xf32>
    %40 = arith.addf %35, %39 : vector<4x256xf32>
    %c0_23 = arith.constant 0 : index
    %c7 = arith.constant 7 : index
    %c0_24 = arith.constant 0 : index
    %c0_25 = arith.constant 0 : index
    %41 = vector.load %arg3[%c0_23, %c7, %c0_24, %c0_25] : memref<4x9x4x1xf32, #tpu.memory_space<vmem>>, vector<1x1x4x1xf32>
    %42 = vector.shape_cast %41 : vector<1x1x4x1xf32> to vector<4x1xf32>
    %43 = vector.broadcast %42 : vector<4x1xf32> to vector<4x256xf32>
    %44 = arith.mulf %43, %17 : vector<4x256xf32>
    %45 = arith.addf %40, %44 : vector<4x256xf32>
    %c0_26 = arith.constant 0 : index
    %c2 = arith.constant 2 : index
    %c0_27 = arith.constant 0 : index
    %c0_28 = arith.constant 0 : index
    %46 = vector.load %arg3[%c0_26, %c2, %c0_27, %c0_28] : memref<4x9x4x1xf32, #tpu.memory_space<vmem>>, vector<1x1x4x1xf32>
    %47 = vector.shape_cast %46 : vector<1x1x4x1xf32> to vector<4x1xf32>
    %48 = vector.broadcast %47 : vector<4x1xf32> to vector<4x256xf32>
    %49 = arith.mulf %48, %12 : vector<4x256xf32>
    %c0_29 = arith.constant 0 : index
    %c5 = arith.constant 5 : index
    %c0_30 = arith.constant 0 : index
    %c0_31 = arith.constant 0 : index
    %50 = vector.load %arg3[%c0_29, %c5, %c0_30, %c0_31] : memref<4x9x4x1xf32, #tpu.memory_space<vmem>>, vector<1x1x4x1xf32>
    %51 = vector.shape_cast %50 : vector<1x1x4x1xf32> to vector<4x1xf32>
    %52 = vector.broadcast %51 : vector<4x1xf32> to vector<4x256xf32>
    %53 = arith.mulf %52, %3 : vector<4x256xf32>
    %54 = arith.addf %49, %53 : vector<4x256xf32>
    %c0_32 = arith.constant 0 : index
    %c8 = arith.constant 8 : index
    %c0_33 = arith.constant 0 : index
    %c0_34 = arith.constant 0 : index
    %55 = vector.load %arg3[%c0_32, %c8, %c0_33, %c0_34] : memref<4x9x4x1xf32, #tpu.memory_space<vmem>>, vector<1x1x4x1xf32>
    %56 = vector.shape_cast %55 : vector<1x1x4x1xf32> to vector<4x1xf32>
    %57 = vector.broadcast %56 : vector<4x1xf32> to vector<4x256xf32>
    %58 = arith.mulf %57, %17 : vector<4x256xf32>
    %59 = arith.addf %54, %58 : vector<4x256xf32>
    %c1_i32_35 = arith.constant 1 : i32
    %60 = vector.broadcast %c1_i32_35 : i32 to vector<1x256xi32>
    %61 = arith.cmpi sge, %0, %60 : vector<1x256xi32>
    %c15_i32_36 = arith.constant 15 : i32
    %62 = vector.broadcast %c15_i32_36 : i32 to vector<1x256xi32>
    %63 = arith.cmpi slt, %0, %62 : vector<1x256xi32>
    %c0_37 = arith.constant 0 : index
    %c0_38 = arith.constant 0 : index
    %c0_39 = arith.constant 0 : index
    %64 = vector.load %arg4[%c0_37, %c0_38, %c0_39] : memref<4x4x1xf32, #tpu.memory_space<vmem>>, vector<1x4x1xf32>
    %65 = vector.shape_cast %64 : vector<1x4x1xf32> to vector<4x1xf32>
    %66 = vector.broadcast %65 : vector<4x1xf32> to vector<4x256xf32>
    %67 = arith.addf %66, %45 : vector<4x256xf32>
    %c1_i32_40 = arith.constant 1 : i32
    %68 = tpu.dynamic_rotate %31 by %c1_i32_40 dim 1 : vector<4x256xf32>, i32 -> vector<4x256xf32>
    %cst_41 = arith.constant 0.000000e+00 : f32
    %69 = vector.shape_cast %61 : vector<1x256xi1> to vector<1x256xi1>
    %70 = vector.broadcast %69 : vector<1x256xi1> to vector<4x256xi1>
    %71 = vector.broadcast %cst_41 : f32 to vector<4x256xf32>
    %72 = arith.select %70, %68, %71 : vector<4x256xi1>, vector<4x256xf32>
    %73 = arith.addf %67, %72 : vector<4x256xf32>
    %c255_i32 = arith.constant 255 : i32
    %74 = tpu.dynamic_rotate %59 by %c255_i32 dim 1 : vector<4x256xf32>, i32 -> vector<4x256xf32>
    %cst_42 = arith.constant 0.000000e+00 : f32
    %75 = vector.shape_cast %63 : vector<1x256xi1> to vector<1x256xi1>
    %76 = vector.broadcast %75 : vector<1x256xi1> to vector<4x256xi1>
    %77 = vector.broadcast %cst_42 : f32 to vector<4x256xf32>
    %78 = arith.select %76, %74, %77 : vector<4x256xi1>, vector<4x256xf32>
    %79 = arith.addf %73, %78 : vector<4x256xf32>
    %c0_43 = arith.constant 0 : index
    %c0_44 = arith.constant 0 : index
    %80 = vector.load %arg5[%c0_43, %c0_44] : memref<16x16xf32, #tpu.memory_space<vmem>>, vector<16x4xf32>
    %cst_45 = arith.constant dense<0.000000e+00> : vector<16x256xf32>
    %81 = tpu.matmul %80, %79, %cst_45 {dimension_numbers = #tpu.dot_dimension_numbers<[1], [0], [0], [1], [0, 0, 1, 1], [], []>} : vector<16x4xf32>, vector<4x256xf32>, vector<16x256xf32> -> vector<16x256xf32>
    %c0_46 = arith.constant 0 : index
    %c0_47 = arith.constant 0 : index
    %82 = vector.load %arg6[%c0_46, %c0_47] : memref<16x1xf32, #tpu.memory_space<vmem>>, vector<16x1xf32>
    %83 = vector.broadcast %82 : vector<16x1xf32> to vector<16x256xf32>
    %84 = arith.addf %81, %83 : vector<16x256xf32>
    %c0_48 = arith.constant 0 : index
    %c0_49 = arith.constant 0 : index
    %c0_50 = arith.constant 0 : index
    %85 = vector.load %arg7[%c0_48, %c0_49, %c0_50] : memref<1x16x256xf32, #tpu.memory_space<vmem>>, vector<1x16x256xf32>
    %86 = vector.shape_cast %85 : vector<1x16x256xf32> to vector<16x256xf32>
    %87 = vector.shape_cast %84 : vector<16x256xf32> to vector<1x16x256xf32>
    tpu.vector_store %arg7[%c0_48, %c0_49, %c0_50], %87 {strides = array<i32>} : memref<1x16x256xf32, #tpu.memory_space<vmem>>, vector<1x16x256xf32>,
    %c0_51 = arith.constant 0 : index
    %c4_52 = arith.constant 4 : index
    %c0_53 = arith.constant 0 : index
    %88 = vector.load %arg2[%c0_51, %c4_52, %c0_53] : memref<1x16x256xf32, #tpu.memory_space<vmem>>, vector<1x4x256xf32>
    %89 = vector.shape_cast %88 : vector<1x4x256xf32> to vector<4x256xf32>
    %c240_i32_54 = arith.constant 240 : i32
    %90 = tpu.dynamic_rotate %89 by %c240_i32_54 dim 1 : vector<4x256xf32>, i32 -> vector<4x256xf32>
    %c16_i32_55 = arith.constant 16 : i32
    %91 = tpu.dynamic_rotate %89 by %c16_i32_55 dim 1 : vector<4x256xf32>, i32 -> vector<4x256xf32>
    %c1_i32_56 = arith.constant 1 : i32
    %92 = vector.broadcast %c1_i32_56 : i32 to vector<1x256xi32>
    %93 = arith.andi %1, %92 : vector<1x256xi32>
    %c0_i32 = arith.constant 0 : i32
    %94 = vector.broadcast %c0_i32 : i32 to vector<1x256xi32>
    %95 = arith.cmpi eq, %93, %94 : vector<1x256xi32>
    %96 = vector.shape_cast %95 : vector<1x256xi1> to vector<1x256xi1>
    %97 = vector.broadcast %96 : vector<1x256xi1> to vector<4x256xi1>
    %98 = arith.select %97, %90, %91 : vector<4x256xi1>, vector<4x256xf32>
    %99 = arith.maximumf %89, %98 : vector<4x256xf32>
    %c255_i32_57 = arith.constant 255 : i32
    %100 = tpu.dynamic_rotate %99 by %c255_i32_57 dim 1 : vector<4x256xf32>, i32 -> vector<4x256xf32>
    %c1_i32_58 = arith.constant 1 : i32
    %101 = tpu.dynamic_rotate %99 by %c1_i32_58 dim 1 : vector<4x256xf32>, i32 -> vector<4x256xf32>
    %c1_i32_59 = arith.constant 1 : i32
    %102 = vector.broadcast %c1_i32_59 : i32 to vector<1x256xi32>
    %103 = arith.andi %0, %102 : vector<1x256xi32>
    %c0_i32_60 = arith.constant 0 : i32
    %104 = vector.broadcast %c0_i32_60 : i32 to vector<1x256xi32>
    %105 = arith.cmpi eq, %103, %104 : vector<1x256xi32>
    %106 = vector.shape_cast %105 : vector<1x256xi1> to vector<1x256xi1>
    %107 = vector.broadcast %106 : vector<1x256xi1> to vector<4x256xi1>
    %108 = arith.select %107, %100, %101 : vector<4x256xi1>, vector<4x256xf32>
    %109 = arith.maximumf %99, %108 : vector<4x256xf32>
    %c2_i32 = arith.constant 2 : i32
    %110 = vector.broadcast %c2_i32 : i32 to vector<1x256xi32>
    %111 = arith.cmpi sge, %1, %110 : vector<1x256xi32>
    %c14_i32 = arith.constant 14 : i32
    %112 = vector.broadcast %c14_i32 : i32 to vector<1x256xi32>
    %113 = arith.cmpi slt, %1, %112 : vector<1x256xi32>
    %c32_i32 = arith.constant 32 : i32
    %114 = tpu.dynamic_rotate %109 by %c32_i32 dim 1 : vector<4x256xf32>, i32 -> vector<4x256xf32>
    %cst_61 = arith.constant 0.000000e+00 : f32
    %115 = vector.shape_cast %111 : vector<1x256xi1> to vector<1x256xi1>
    %116 = vector.broadcast %115 : vector<1x256xi1> to vector<4x256xi1>
    %117 = vector.broadcast %cst_61 : f32 to vector<4x256xf32>
    %118 = arith.select %116, %114, %117 : vector<4x256xi1>, vector<4x256xf32>
    %c224_i32 = arith.constant 224 : i32
    %119 = tpu.dynamic_rotate %109 by %c224_i32 dim 1 : vector<4x256xf32>, i32 -> vector<4x256xf32>
    %cst_62 = arith.constant 0.000000e+00 : f32
    %120 = vector.shape_cast %113 : vector<1x256xi1> to vector<1x256xi1>
    %121 = vector.broadcast %120 : vector<1x256xi1> to vector<4x256xi1>
    %122 = vector.broadcast %cst_62 : f32 to vector<4x256xf32>
    %123 = arith.select %121, %119, %122 : vector<4x256xi1>, vector<4x256xf32>
    %c1_63 = arith.constant 1 : index
    %c0_64 = arith.constant 0 : index
    %c0_65 = arith.constant 0 : index
    %c0_66 = arith.constant 0 : index
    %124 = vector.load %arg3[%c1_63, %c0_64, %c0_65, %c0_66] : memref<4x9x4x1xf32, #tpu.memory_space<vmem>>, vector<1x1x4x1xf32>
    %125 = vector.shape_cast %124 : vector<1x1x4x1xf32> to vector<4x1xf32>
    %126 = vector.broadcast %125 : vector<4x1xf32> to vector<4x256xf32>
    %127 = arith.mulf %126, %118 : vector<4x256xf32>
    %c1_67 = arith.constant 1 : index
    %c3_68 = arith.constant 3 : index
    %c0_69 = arith.constant 0 : index
    %c0_70 = arith.constant 0 : index
    %128 = vector.load %arg3[%c1_67, %c3_68, %c0_69, %c0_70] : memref<4x9x4x1xf32, #tpu.memory_space<vmem>>, vector<1x1x4x1xf32>
    %129 = vector.shape_cast %128 : vector<1x1x4x1xf32> to vector<4x1xf32>
    %130 = vector.broadcast %129 : vector<4x1xf32> to vector<4x256xf32>
    %131 = arith.mulf %130, %109 : vector<4x256xf32>
    %132 = arith.addf %127, %131 : vector<4x256xf32>
    %c1_71 = arith.constant 1 : index
    %c6_72 = arith.constant 6 : index
    %c0_73 = arith.constant 0 : index
    %c0_74 = arith.constant 0 : index
    %133 = vector.load %arg3[%c1_71, %c6_72, %c0_73, %c0_74] : memref<4x9x4x1xf32, #tpu.memory_space<vmem>>, vector<1x1x4x1xf32>
    %134 = vector.shape_cast %133 : vector<1x1x4x1xf32> to vector<4x1xf32>
    %135 = vector.broadcast %134 : vector<4x1xf32> to vector<4x256xf32>
    %136 = arith.mulf %135, %123 : vector<4x256xf32>
    %137 = arith.addf %132, %136 : vector<4x256xf32>
    %c1_75 = arith.constant 1 : index
    %c1_76 = arith.constant 1 : index
    %c0_77 = arith.constant 0 : index
    %c0_78 = arith.constant 0 : index
    %138 = vector.load %arg3[%c1_75, %c1_76, %c0_77, %c0_78] : memref<4x9x4x1xf32, #tpu.memory_space<vmem>>, vector<1x1x4x1xf32>
    %139 = vector.shape_cast %138 : vector<1x1x4x1xf32> to vector<4x1xf32>
    %140 = vector.broadcast %139 : vector<4x1xf32> to vector<4x256xf32>
    %141 = arith.mulf %140, %118 : vector<4x256xf32>
    %c1_79 = arith.constant 1 : index
    %c4_80 = arith.constant 4 : index
    %c0_81 = arith.constant 0 : index
    %c0_82 = arith.constant 0 : index
    %142 = vector.load %arg3[%c1_79, %c4_80, %c0_81, %c0_82] : memref<4x9x4x1xf32, #tpu.memory_space<vmem>>, vector<1x1x4x1xf32>
    %143 = vector.shape_cast %142 : vector<1x1x4x1xf32> to vector<4x1xf32>
    %144 = vector.broadcast %143 : vector<4x1xf32> to vector<4x256xf32>
    %145 = arith.mulf %144, %109 : vector<4x256xf32>
    %146 = arith.addf %141, %145 : vector<4x256xf32>
    %c1_83 = arith.constant 1 : index
    %c7_84 = arith.constant 7 : index
    %c0_85 = arith.constant 0 : index
    %c0_86 = arith.constant 0 : index
    %147 = vector.load %arg3[%c1_83, %c7_84, %c0_85, %c0_86] : memref<4x9x4x1xf32, #tpu.memory_space<vmem>>, vector<1x1x4x1xf32>
    %148 = vector.shape_cast %147 : vector<1x1x4x1xf32> to vector<4x1xf32>
    %149 = vector.broadcast %148 : vector<4x1xf32> to vector<4x256xf32>
    %150 = arith.mulf %149, %123 : vector<4x256xf32>
    %151 = arith.addf %146, %150 : vector<4x256xf32>
    %c1_87 = arith.constant 1 : index
    %c2_88 = arith.constant 2 : index
    %c0_89 = arith.constant 0 : index
    %c0_90 = arith.constant 0 : index
    %152 = vector.load %arg3[%c1_87, %c2_88, %c0_89, %c0_90] : memref<4x9x4x1xf32, #tpu.memory_space<vmem>>, vector<1x1x4x1xf32>
    %153 = vector.shape_cast %152 : vector<1x1x4x1xf32> to vector<4x1xf32>
    %154 = vector.broadcast %153 : vector<4x1xf32> to vector<4x256xf32>
    %155 = arith.mulf %154, %118 : vector<4x256xf32>
    %c1_91 = arith.constant 1 : index
    %c5_92 = arith.constant 5 : index
    %c0_93 = arith.constant 0 : index
    %c0_94 = arith.constant 0 : index
    %156 = vector.load %arg3[%c1_91, %c5_92, %c0_93, %c0_94] : memref<4x9x4x1xf32, #tpu.memory_space<vmem>>, vector<1x1x4x1xf32>
    %157 = vector.shape_cast %156 : vector<1x1x4x1xf32> to vector<4x1xf32>
    %158 = vector.broadcast %157 : vector<4x1xf32> to vector<4x256xf32>
    %159 = arith.mulf %158, %109 : vector<4x256xf32>
    %160 = arith.addf %155, %159 : vector<4x256xf32>
    %c1_95 = arith.constant 1 : index
    %c8_96 = arith.constant 8 : index
    %c0_97 = arith.constant 0 : index
    %c0_98 = arith.constant 0 : index
    %161 = vector.load %arg3[%c1_95, %c8_96, %c0_97, %c0_98] : memref<4x9x4x1xf32, #tpu.memory_space<vmem>>, vector<1x1x4x1xf32>
    %162 = vector.shape_cast %161 : vector<1x1x4x1xf32> to vector<4x1xf32>
    %163 = vector.broadcast %162 : vector<4x1xf32> to vector<4x256xf32>
    %164 = arith.mulf %163, %123 : vector<4x256xf32>
    %165 = arith.addf %160, %164 : vector<4x256xf32>
    %c2_i32_99 = arith.constant 2 : i32
    %166 = vector.broadcast %c2_i32_99 : i32 to vector<1x256xi32>
    %167 = arith.cmpi sge, %0, %166 : vector<1x256xi32>
    %c14_i32_100 = arith.constant 14 : i32
    %168 = vector.broadcast %c14_i32_100 : i32 to vector<1x256xi32>
    %169 = arith.cmpi slt, %0, %168 : vector<1x256xi32>
    %c1_101 = arith.constant 1 : index
    %c0_102 = arith.constant 0 : index
    %c0_103 = arith.constant 0 : index
    %170 = vector.load %arg4[%c1_101, %c0_102, %c0_103] : memref<4x4x1xf32, #tpu.memory_space<vmem>>, vector<1x4x1xf32>
    %171 = vector.shape_cast %170 : vector<1x4x1xf32> to vector<4x1xf32>
    %172 = vector.broadcast %171 : vector<4x1xf32> to vector<4x256xf32>
    %173 = arith.addf %172, %151 : vector<4x256xf32>
    %c2_i32_104 = arith.constant 2 : i32
    %174 = tpu.dynamic_rotate %137 by %c2_i32_104 dim 1 : vector<4x256xf32>, i32 -> vector<4x256xf32>
    %cst_105 = arith.constant 0.000000e+00 : f32
    %175 = vector.shape_cast %167 : vector<1x256xi1> to vector<1x256xi1>
    %176 = vector.broadcast %175 : vector<1x256xi1> to vector<4x256xi1>
    %177 = vector.broadcast %cst_105 : f32 to vector<4x256xf32>
    %178 = arith.select %176, %174, %177 : vector<4x256xi1>, vector<4x256xf32>
    %179 = arith.addf %173, %178 : vector<4x256xf32>
    %c254_i32 = arith.constant 254 : i32
    %180 = tpu.dynamic_rotate %165 by %c254_i32 dim 1 : vector<4x256xf32>, i32 -> vector<4x256xf32>
    %cst_106 = arith.constant 0.000000e+00 : f32
    %181 = vector.shape_cast %169 : vector<1x256xi1> to vector<1x256xi1>
    %182 = vector.broadcast %181 : vector<1x256xi1> to vector<4x256xi1>
    %183 = vector.broadcast %cst_106 : f32 to vector<4x256xf32>
    %184 = arith.select %182, %180, %183 : vector<4x256xi1>, vector<4x256xf32>
    %185 = arith.addf %179, %184 : vector<4x256xf32>
    %c0_107 = arith.constant 0 : index
    %c4_108 = arith.constant 4 : index
    %186 = vector.load %arg5[%c0_107, %c4_108] : memref<16x16xf32, #tpu.memory_space<vmem>>, vector<16x4xf32>
    %cst_109 = arith.constant dense<0.000000e+00> : vector<16x256xf32>
    %187 = tpu.matmul %186, %185, %cst_109 {dimension_numbers = #tpu.dot_dimension_numbers<[1], [0], [0], [1], [0, 0, 1, 1], [], []>} : vector<16x4xf32>, vector<4x256xf32>, vector<16x256xf32> -> vector<16x256xf32>
    %c0_110 = arith.constant 0 : index
    %c0_111 = arith.constant 0 : index
    %c0_112 = arith.constant 0 : index
    %188 = vector.load %arg7[%c0_110, %c0_111, %c0_112] : memref<1x16x256xf32, #tpu.memory_space<vmem>>, vector<1x16x256xf32>
    %189 = vector.shape_cast %188 : vector<1x16x256xf32> to vector<16x256xf32>
    %190 = arith.addf %189, %187 : vector<16x256xf32>
    %c0_113 = arith.constant 0 : index
    %c0_114 = arith.constant 0 : index
    %c0_115 = arith.constant 0 : index
    %191 = vector.load %arg7[%c0_113, %c0_114, %c0_115] : memref<1x16x256xf32, #tpu.memory_space<vmem>>, vector<1x16x256xf32>
    %192 = vector.shape_cast %191 : vector<1x16x256xf32> to vector<16x256xf32>
    %193 = vector.shape_cast %190 : vector<16x256xf32> to vector<1x16x256xf32>
    tpu.vector_store %arg7[%c0_113, %c0_114, %c0_115], %193 {strides = array<i32>} : memref<1x16x256xf32, #tpu.memory_space<vmem>>, vector<1x16x256xf32>,
    %c0_116 = arith.constant 0 : index
    %c8_117 = arith.constant 8 : index
    %c0_118 = arith.constant 0 : index
    %194 = vector.load %arg2[%c0_116, %c8_117, %c0_118] : memref<1x16x256xf32, #tpu.memory_space<vmem>>, vector<1x4x256xf32>
    %195 = vector.shape_cast %194 : vector<1x4x256xf32> to vector<4x256xf32>
    %c240_i32_119 = arith.constant 240 : i32
    %196 = tpu.dynamic_rotate %195 by %c240_i32_119 dim 1 : vector<4x256xf32>, i32 -> vector<4x256xf32>
    %c16_i32_120 = arith.constant 16 : i32
    %197 = tpu.dynamic_rotate %195 by %c16_i32_120 dim 1 : vector<4x256xf32>, i32 -> vector<4x256xf32>
    %c1_i32_121 = arith.constant 1 : i32
    %198 = vector.broadcast %c1_i32_121 : i32 to vector<1x256xi32>
    %199 = arith.andi %1, %198 : vector<1x256xi32>
    %c0_i32_122 = arith.constant 0 : i32
    %200 = vector.broadcast %c0_i32_122 : i32 to vector<1x256xi32>
    %201 = arith.cmpi eq, %199, %200 : vector<1x256xi32>
    %202 = vector.shape_cast %201 : vector<1x256xi1> to vector<1x256xi1>
    %203 = vector.broadcast %202 : vector<1x256xi1> to vector<4x256xi1>
    %204 = arith.select %203, %196, %197 : vector<4x256xi1>, vector<4x256xf32>
    %205 = arith.maximumf %195, %204 : vector<4x256xf32>
    %c255_i32_123 = arith.constant 255 : i32
    %206 = tpu.dynamic_rotate %205 by %c255_i32_123 dim 1 : vector<4x256xf32>, i32 -> vector<4x256xf32>
    %c1_i32_124 = arith.constant 1 : i32
    %207 = tpu.dynamic_rotate %205 by %c1_i32_124 dim 1 : vector<4x256xf32>, i32 -> vector<4x256xf32>
    %c1_i32_125 = arith.constant 1 : i32
    %208 = vector.broadcast %c1_i32_125 : i32 to vector<1x256xi32>
    %209 = arith.andi %0, %208 : vector<1x256xi32>
    %c0_i32_126 = arith.constant 0 : i32
    %210 = vector.broadcast %c0_i32_126 : i32 to vector<1x256xi32>
    %211 = arith.cmpi eq, %209, %210 : vector<1x256xi32>
    %212 = vector.shape_cast %211 : vector<1x256xi1> to vector<1x256xi1>
    %213 = vector.broadcast %212 : vector<1x256xi1> to vector<4x256xi1>
    %214 = arith.select %213, %206, %207 : vector<4x256xi1>, vector<4x256xf32>
    %215 = arith.maximumf %205, %214 : vector<4x256xf32>
    %c224_i32_127 = arith.constant 224 : i32
    %216 = tpu.dynamic_rotate %215 by %c224_i32_127 dim 1 : vector<4x256xf32>, i32 -> vector<4x256xf32>
    %c32_i32_128 = arith.constant 32 : i32
    %217 = tpu.dynamic_rotate %215 by %c32_i32_128 dim 1 : vector<4x256xf32>, i32 -> vector<4x256xf32>
    %c2_i32_129 = arith.constant 2 : i32
    %218 = vector.broadcast %c2_i32_129 : i32 to vector<1x256xi32>
    %219 = arith.andi %1, %218 : vector<1x256xi32>
    %c0_i32_130 = arith.constant 0 : i32
    %220 = vector.broadcast %c0_i32_130 : i32 to vector<1x256xi32>
    %221 = arith.cmpi eq, %219, %220 : vector<1x256xi32>
    %222 = vector.shape_cast %221 : vector<1x256xi1> to vector<1x256xi1>
    %223 = vector.broadcast %222 : vector<1x256xi1> to vector<4x256xi1>
    %224 = arith.select %223, %216, %217 : vector<4x256xi1>, vector<4x256xf32>
    %225 = arith.maximumf %215, %224 : vector<4x256xf32>
    %c254_i32_131 = arith.constant 254 : i32
    %226 = tpu.dynamic_rotate %225 by %c254_i32_131 dim 1 : vector<4x256xf32>, i32 -> vector<4x256xf32>
    %c2_i32_132 = arith.constant 2 : i32
    %227 = tpu.dynamic_rotate %225 by %c2_i32_132 dim 1 : vector<4x256xf32>, i32 -> vector<4x256xf32>
    %c2_i32_133 = arith.constant 2 : i32
    %228 = vector.broadcast %c2_i32_133 : i32 to vector<1x256xi32>
    %229 = arith.andi %0, %228 : vector<1x256xi32>
    %c0_i32_134 = arith.constant 0 : i32
    %230 = vector.broadcast %c0_i32_134 : i32 to vector<1x256xi32>
    %231 = arith.cmpi eq, %229, %230 : vector<1x256xi32>
    %232 = vector.shape_cast %231 : vector<1x256xi1> to vector<1x256xi1>
    %233 = vector.broadcast %232 : vector<1x256xi1> to vector<4x256xi1>
    %234 = arith.select %233, %226, %227 : vector<4x256xi1>, vector<4x256xf32>
    %235 = arith.maximumf %225, %234 : vector<4x256xf32>
    %c4_i32 = arith.constant 4 : i32
    %236 = vector.broadcast %c4_i32 : i32 to vector<1x256xi32>
    %237 = arith.cmpi sge, %1, %236 : vector<1x256xi32>
    %c12_i32 = arith.constant 12 : i32
    %238 = vector.broadcast %c12_i32 : i32 to vector<1x256xi32>
    %239 = arith.cmpi slt, %1, %238 : vector<1x256xi32>
    %c64_i32 = arith.constant 64 : i32
    %240 = tpu.dynamic_rotate %235 by %c64_i32 dim 1 : vector<4x256xf32>, i32 -> vector<4x256xf32>
    %cst_135 = arith.constant 0.000000e+00 : f32
    %241 = vector.shape_cast %237 : vector<1x256xi1> to vector<1x256xi1>
    %242 = vector.broadcast %241 : vector<1x256xi1> to vector<4x256xi1>
    %243 = vector.broadcast %cst_135 : f32 to vector<4x256xf32>
    %244 = arith.select %242, %240, %243 : vector<4x256xi1>, vector<4x256xf32>
    %c192_i32 = arith.constant 192 : i32
    %245 = tpu.dynamic_rotate %235 by %c192_i32 dim 1 : vector<4x256xf32>, i32 -> vector<4x256xf32>
    %cst_136 = arith.constant 0.000000e+00 : f32
    %246 = vector.shape_cast %239 : vector<1x256xi1> to vector<1x256xi1>
    %247 = vector.broadcast %246 : vector<1x256xi1> to vector<4x256xi1>
    %248 = vector.broadcast %cst_136 : f32 to vector<4x256xf32>
    %249 = arith.select %247, %245, %248 : vector<4x256xi1>, vector<4x256xf32>
    %c2_137 = arith.constant 2 : index
    %c0_138 = arith.constant 0 : index
    %c0_139 = arith.constant 0 : index
    %c0_140 = arith.constant 0 : index
    %250 = vector.load %arg3[%c2_137, %c0_138, %c0_139, %c0_140] : memref<4x9x4x1xf32, #tpu.memory_space<vmem>>, vector<1x1x4x1xf32>
    %251 = vector.shape_cast %250 : vector<1x1x4x1xf32> to vector<4x1xf32>
    %252 = vector.broadcast %251 : vector<4x1xf32> to vector<4x256xf32>
    %253 = arith.mulf %252, %244 : vector<4x256xf32>
    %c2_141 = arith.constant 2 : index
    %c3_142 = arith.constant 3 : index
    %c0_143 = arith.constant 0 : index
    %c0_144 = arith.constant 0 : index
    %254 = vector.load %arg3[%c2_141, %c3_142, %c0_143, %c0_144] : memref<4x9x4x1xf32, #tpu.memory_space<vmem>>, vector<1x1x4x1xf32>
    %255 = vector.shape_cast %254 : vector<1x1x4x1xf32> to vector<4x1xf32>
    %256 = vector.broadcast %255 : vector<4x1xf32> to vector<4x256xf32>
    %257 = arith.mulf %256, %235 : vector<4x256xf32>
    %258 = arith.addf %253, %257 : vector<4x256xf32>
    %c2_145 = arith.constant 2 : index
    %c6_146 = arith.constant 6 : index
    %c0_147 = arith.constant 0 : index
    %c0_148 = arith.constant 0 : index
    %259 = vector.load %arg3[%c2_145, %c6_146, %c0_147, %c0_148] : memref<4x9x4x1xf32, #tpu.memory_space<vmem>>, vector<1x1x4x1xf32>
    %260 = vector.shape_cast %259 : vector<1x1x4x1xf32> to vector<4x1xf32>
    %261 = vector.broadcast %260 : vector<4x1xf32> to vector<4x256xf32>
    %262 = arith.mulf %261, %249 : vector<4x256xf32>
    %263 = arith.addf %258, %262 : vector<4x256xf32>
    %c2_149 = arith.constant 2 : index
    %c1_150 = arith.constant 1 : index
    %c0_151 = arith.constant 0 : index
    %c0_152 = arith.constant 0 : index
    %264 = vector.load %arg3[%c2_149, %c1_150, %c0_151, %c0_152] : memref<4x9x4x1xf32, #tpu.memory_space<vmem>>, vector<1x1x4x1xf32>
    %265 = vector.shape_cast %264 : vector<1x1x4x1xf32> to vector<4x1xf32>
    %266 = vector.broadcast %265 : vector<4x1xf32> to vector<4x256xf32>
    %267 = arith.mulf %266, %244 : vector<4x256xf32>
    %c2_153 = arith.constant 2 : index
    %c4_154 = arith.constant 4 : index
    %c0_155 = arith.constant 0 : index
    %c0_156 = arith.constant 0 : index
    %268 = vector.load %arg3[%c2_153, %c4_154, %c0_155, %c0_156] : memref<4x9x4x1xf32, #tpu.memory_space<vmem>>, vector<1x1x4x1xf32>
    %269 = vector.shape_cast %268 : vector<1x1x4x1xf32> to vector<4x1xf32>
    %270 = vector.broadcast %269 : vector<4x1xf32> to vector<4x256xf32>
    %271 = arith.mulf %270, %235 : vector<4x256xf32>
    %272 = arith.addf %267, %271 : vector<4x256xf32>
    %c2_157 = arith.constant 2 : index
    %c7_158 = arith.constant 7 : index
    %c0_159 = arith.constant 0 : index
    %c0_160 = arith.constant 0 : index
    %273 = vector.load %arg3[%c2_157, %c7_158, %c0_159, %c0_160] : memref<4x9x4x1xf32, #tpu.memory_space<vmem>>, vector<1x1x4x1xf32>
    %274 = vector.shape_cast %273 : vector<1x1x4x1xf32> to vector<4x1xf32>
    %275 = vector.broadcast %274 : vector<4x1xf32> to vector<4x256xf32>
    %276 = arith.mulf %275, %249 : vector<4x256xf32>
    %277 = arith.addf %272, %276 : vector<4x256xf32>
    %c2_161 = arith.constant 2 : index
    %c2_162 = arith.constant 2 : index
    %c0_163 = arith.constant 0 : index
    %c0_164 = arith.constant 0 : index
    %278 = vector.load %arg3[%c2_161, %c2_162, %c0_163, %c0_164] : memref<4x9x4x1xf32, #tpu.memory_space<vmem>>, vector<1x1x4x1xf32>
    %279 = vector.shape_cast %278 : vector<1x1x4x1xf32> to vector<4x1xf32>
    %280 = vector.broadcast %279 : vector<4x1xf32> to vector<4x256xf32>
    %281 = arith.mulf %280, %244 : vector<4x256xf32>
    %c2_165 = arith.constant 2 : index
    %c5_166 = arith.constant 5 : index
    %c0_167 = arith.constant 0 : index
    %c0_168 = arith.constant 0 : index
    %282 = vector.load %arg3[%c2_165, %c5_166, %c0_167, %c0_168] : memref<4x9x4x1xf32, #tpu.memory_space<vmem>>, vector<1x1x4x1xf32>
    %283 = vector.shape_cast %282 : vector<1x1x4x1xf32> to vector<4x1xf32>
    %284 = vector.broadcast %283 : vector<4x1xf32> to vector<4x256xf32>
    %285 = arith.mulf %284, %235 : vector<4x256xf32>
    %286 = arith.addf %281, %285 : vector<4x256xf32>
    %c2_169 = arith.constant 2 : index
    %c8_170 = arith.constant 8 : index
    %c0_171 = arith.constant 0 : index
    %c0_172 = arith.constant 0 : index
    %287 = vector.load %arg3[%c2_169, %c8_170, %c0_171, %c0_172] : memref<4x9x4x1xf32, #tpu.memory_space<vmem>>, vector<1x1x4x1xf32>
    %288 = vector.shape_cast %287 : vector<1x1x4x1xf32> to vector<4x1xf32>
    %289 = vector.broadcast %288 : vector<4x1xf32> to vector<4x256xf32>
    %290 = arith.mulf %289, %249 : vector<4x256xf32>
    %291 = arith.addf %286, %290 : vector<4x256xf32>
    %c4_i32_173 = arith.constant 4 : i32
    %292 = vector.broadcast %c4_i32_173 : i32 to vector<1x256xi32>
    %293 = arith.cmpi sge, %0, %292 : vector<1x256xi32>
    %c12_i32_174 = arith.constant 12 : i32
    %294 = vector.broadcast %c12_i32_174 : i32 to vector<1x256xi32>
    %295 = arith.cmpi slt, %0, %294 : vector<1x256xi32>
    %c2_175 = arith.constant 2 : index
    %c0_176 = arith.constant 0 : index
    %c0_177 = arith.constant 0 : index
    %296 = vector.load %arg4[%c2_175, %c0_176, %c0_177] : memref<4x4x1xf32, #tpu.memory_space<vmem>>, vector<1x4x1xf32>
    %297 = vector.shape_cast %296 : vector<1x4x1xf32> to vector<4x1xf32>
    %298 = vector.broadcast %297 : vector<4x1xf32> to vector<4x256xf32>
    %299 = arith.addf %298, %277 : vector<4x256xf32>
    %c4_i32_178 = arith.constant 4 : i32
    %300 = tpu.dynamic_rotate %263 by %c4_i32_178 dim 1 : vector<4x256xf32>, i32 -> vector<4x256xf32>
    %cst_179 = arith.constant 0.000000e+00 : f32
    %301 = vector.shape_cast %293 : vector<1x256xi1> to vector<1x256xi1>
    %302 = vector.broadcast %301 : vector<1x256xi1> to vector<4x256xi1>
    %303 = vector.broadcast %cst_179 : f32 to vector<4x256xf32>
    %304 = arith.select %302, %300, %303 : vector<4x256xi1>, vector<4x256xf32>
    %305 = arith.addf %299, %304 : vector<4x256xf32>
    %c252_i32 = arith.constant 252 : i32
    %306 = tpu.dynamic_rotate %291 by %c252_i32 dim 1 : vector<4x256xf32>, i32 -> vector<4x256xf32>
    %cst_180 = arith.constant 0.000000e+00 : f32
    %307 = vector.shape_cast %295 : vector<1x256xi1> to vector<1x256xi1>
    %308 = vector.broadcast %307 : vector<1x256xi1> to vector<4x256xi1>
    %309 = vector.broadcast %cst_180 : f32 to vector<4x256xf32>
    %310 = arith.select %308, %306, %309 : vector<4x256xi1>, vector<4x256xf32>
    %311 = arith.addf %305, %310 : vector<4x256xf32>
    %c0_181 = arith.constant 0 : index
    %c8_182 = arith.constant 8 : index
    %312 = vector.load %arg5[%c0_181, %c8_182] : memref<16x16xf32, #tpu.memory_space<vmem>>, vector<16x4xf32>
    %cst_183 = arith.constant dense<0.000000e+00> : vector<16x256xf32>
    %313 = tpu.matmul %312, %311, %cst_183 {dimension_numbers = #tpu.dot_dimension_numbers<[1], [0], [0], [1], [0, 0, 1, 1], [], []>} : vector<16x4xf32>, vector<4x256xf32>, vector<16x256xf32> -> vector<16x256xf32>
    %c0_184 = arith.constant 0 : index
    %c0_185 = arith.constant 0 : index
    %c0_186 = arith.constant 0 : index
    %314 = vector.load %arg7[%c0_184, %c0_185, %c0_186] : memref<1x16x256xf32, #tpu.memory_space<vmem>>, vector<1x16x256xf32>
    %315 = vector.shape_cast %314 : vector<1x16x256xf32> to vector<16x256xf32>
    %316 = arith.addf %315, %313 : vector<16x256xf32>
    %c0_187 = arith.constant 0 : index
    %c0_188 = arith.constant 0 : index
    %c0_189 = arith.constant 0 : index
    %317 = vector.load %arg7[%c0_187, %c0_188, %c0_189] : memref<1x16x256xf32, #tpu.memory_space<vmem>>, vector<1x16x256xf32>
    %318 = vector.shape_cast %317 : vector<1x16x256xf32> to vector<16x256xf32>
    %319 = vector.shape_cast %316 : vector<16x256xf32> to vector<1x16x256xf32>
    tpu.vector_store %arg7[%c0_187, %c0_188, %c0_189], %319 {strides = array<i32>} : memref<1x16x256xf32, #tpu.memory_space<vmem>>, vector<1x16x256xf32>,
    %c0_190 = arith.constant 0 : index
    %c12 = arith.constant 12 : index
    %c0_191 = arith.constant 0 : index
    %320 = vector.load %arg2[%c0_190, %c12, %c0_191] : memref<1x16x256xf32, #tpu.memory_space<vmem>>, vector<1x4x256xf32>
    %321 = vector.shape_cast %320 : vector<1x4x256xf32> to vector<4x256xf32>
    %c240_i32_192 = arith.constant 240 : i32
    %322 = tpu.dynamic_rotate %321 by %c240_i32_192 dim 1 : vector<4x256xf32>, i32 -> vector<4x256xf32>
    %c16_i32_193 = arith.constant 16 : i32
    %323 = tpu.dynamic_rotate %321 by %c16_i32_193 dim 1 : vector<4x256xf32>, i32 -> vector<4x256xf32>
    %c1_i32_194 = arith.constant 1 : i32
    %324 = vector.broadcast %c1_i32_194 : i32 to vector<1x256xi32>
    %325 = arith.andi %1, %324 : vector<1x256xi32>
    %c0_i32_195 = arith.constant 0 : i32
    %326 = vector.broadcast %c0_i32_195 : i32 to vector<1x256xi32>
    %327 = arith.cmpi eq, %325, %326 : vector<1x256xi32>
    %328 = vector.shape_cast %327 : vector<1x256xi1> to vector<1x256xi1>
    %329 = vector.broadcast %328 : vector<1x256xi1> to vector<4x256xi1>
    %330 = arith.select %329, %322, %323 : vector<4x256xi1>, vector<4x256xf32>
    %331 = arith.maximumf %321, %330 : vector<4x256xf32>
    %c255_i32_196 = arith.constant 255 : i32
    %332 = tpu.dynamic_rotate %331 by %c255_i32_196 dim 1 : vector<4x256xf32>, i32 -> vector<4x256xf32>
    %c1_i32_197 = arith.constant 1 : i32
    %333 = tpu.dynamic_rotate %331 by %c1_i32_197 dim 1 : vector<4x256xf32>, i32 -> vector<4x256xf32>
    %c1_i32_198 = arith.constant 1 : i32
    %334 = vector.broadcast %c1_i32_198 : i32 to vector<1x256xi32>
    %335 = arith.andi %0, %334 : vector<1x256xi32>
    %c0_i32_199 = arith.constant 0 : i32
    %336 = vector.broadcast %c0_i32_199 : i32 to vector<1x256xi32>
    %337 = arith.cmpi eq, %335, %336 : vector<1x256xi32>
    %338 = vector.shape_cast %337 : vector<1x256xi1> to vector<1x256xi1>
    %339 = vector.broadcast %338 : vector<1x256xi1> to vector<4x256xi1>
    %340 = arith.select %339, %332, %333 : vector<4x256xi1>, vector<4x256xf32>
    %341 = arith.maximumf %331, %340 : vector<4x256xf32>
    %c224_i32_200 = arith.constant 224 : i32
    %342 = tpu.dynamic_rotate %341 by %c224_i32_200 dim 1 : vector<4x256xf32>, i32 -> vector<4x256xf32>
    %c32_i32_201 = arith.constant 32 : i32
    %343 = tpu.dynamic_rotate %341 by %c32_i32_201 dim 1 : vector<4x256xf32>, i32 -> vector<4x256xf32>
    %c2_i32_202 = arith.constant 2 : i32
    %344 = vector.broadcast %c2_i32_202 : i32 to vector<1x256xi32>
    %345 = arith.andi %1, %344 : vector<1x256xi32>
    %c0_i32_203 = arith.constant 0 : i32
    %346 = vector.broadcast %c0_i32_203 : i32 to vector<1x256xi32>
    %347 = arith.cmpi eq, %345, %346 : vector<1x256xi32>
    %348 = vector.shape_cast %347 : vector<1x256xi1> to vector<1x256xi1>
    %349 = vector.broadcast %348 : vector<1x256xi1> to vector<4x256xi1>
    %350 = arith.select %349, %342, %343 : vector<4x256xi1>, vector<4x256xf32>
    %351 = arith.maximumf %341, %350 : vector<4x256xf32>
    %c254_i32_204 = arith.constant 254 : i32
    %352 = tpu.dynamic_rotate %351 by %c254_i32_204 dim 1 : vector<4x256xf32>, i32 -> vector<4x256xf32>
    %c2_i32_205 = arith.constant 2 : i32
    %353 = tpu.dynamic_rotate %351 by %c2_i32_205 dim 1 : vector<4x256xf32>, i32 -> vector<4x256xf32>
    %c2_i32_206 = arith.constant 2 : i32
    %354 = vector.broadcast %c2_i32_206 : i32 to vector<1x256xi32>
    %355 = arith.andi %0, %354 : vector<1x256xi32>
    %c0_i32_207 = arith.constant 0 : i32
    %356 = vector.broadcast %c0_i32_207 : i32 to vector<1x256xi32>
    %357 = arith.cmpi eq, %355, %356 : vector<1x256xi32>
    %358 = vector.shape_cast %357 : vector<1x256xi1> to vector<1x256xi1>
    %359 = vector.broadcast %358 : vector<1x256xi1> to vector<4x256xi1>
    %360 = arith.select %359, %352, %353 : vector<4x256xi1>, vector<4x256xf32>
    %361 = arith.maximumf %351, %360 : vector<4x256xf32>
    %c192_i32_208 = arith.constant 192 : i32
    %362 = tpu.dynamic_rotate %361 by %c192_i32_208 dim 1 : vector<4x256xf32>, i32 -> vector<4x256xf32>
    %c64_i32_209 = arith.constant 64 : i32
    %363 = tpu.dynamic_rotate %361 by %c64_i32_209 dim 1 : vector<4x256xf32>, i32 -> vector<4x256xf32>
    %c4_i32_210 = arith.constant 4 : i32
    %364 = vector.broadcast %c4_i32_210 : i32 to vector<1x256xi32>
    %365 = arith.andi %1, %364 : vector<1x256xi32>
    %c0_i32_211 = arith.constant 0 : i32
    %366 = vector.broadcast %c0_i32_211 : i32 to vector<1x256xi32>
    %367 = arith.cmpi eq, %365, %366 : vector<1x256xi32>
    %368 = vector.shape_cast %367 : vector<1x256xi1> to vector<1x256xi1>
    %369 = vector.broadcast %368 : vector<1x256xi1> to vector<4x256xi1>
    %370 = arith.select %369, %362, %363 : vector<4x256xi1>, vector<4x256xf32>
    %371 = arith.maximumf %361, %370 : vector<4x256xf32>
    %c252_i32_212 = arith.constant 252 : i32
    %372 = tpu.dynamic_rotate %371 by %c252_i32_212 dim 1 : vector<4x256xf32>, i32 -> vector<4x256xf32>
    %c4_i32_213 = arith.constant 4 : i32
    %373 = tpu.dynamic_rotate %371 by %c4_i32_213 dim 1 : vector<4x256xf32>, i32 -> vector<4x256xf32>
    %c4_i32_214 = arith.constant 4 : i32
    %374 = vector.broadcast %c4_i32_214 : i32 to vector<1x256xi32>
    %375 = arith.andi %0, %374 : vector<1x256xi32>
    %c0_i32_215 = arith.constant 0 : i32
    %376 = vector.broadcast %c0_i32_215 : i32 to vector<1x256xi32>
    %377 = arith.cmpi eq, %375, %376 : vector<1x256xi32>
    %378 = vector.shape_cast %377 : vector<1x256xi1> to vector<1x256xi1>
    %379 = vector.broadcast %378 : vector<1x256xi1> to vector<4x256xi1>
    %380 = arith.select %379, %372, %373 : vector<4x256xi1>, vector<4x256xf32>
    %381 = arith.maximumf %371, %380 : vector<4x256xf32>
    %c8_i32 = arith.constant 8 : i32
    %382 = vector.broadcast %c8_i32 : i32 to vector<1x256xi32>
    %383 = arith.cmpi sge, %1, %382 : vector<1x256xi32>
    %c8_i32_216 = arith.constant 8 : i32
    %384 = vector.broadcast %c8_i32_216 : i32 to vector<1x256xi32>
    %385 = arith.cmpi slt, %1, %384 : vector<1x256xi32>
    %c128_i32 = arith.constant 128 : i32
    %386 = tpu.dynamic_rotate %381 by %c128_i32 dim 1 : vector<4x256xf32>, i32 -> vector<4x256xf32>
    %cst_217 = arith.constant 0.000000e+00 : f32
    %387 = vector.shape_cast %383 : vector<1x256xi1> to vector<1x256xi1>
    %388 = vector.broadcast %387 : vector<1x256xi1> to vector<4x256xi1>
    %389 = vector.broadcast %cst_217 : f32 to vector<4x256xf32>
    %390 = arith.select %388, %386, %389 : vector<4x256xi1>, vector<4x256xf32>
    %c128_i32_218 = arith.constant 128 : i32
    %391 = tpu.dynamic_rotate %381 by %c128_i32_218 dim 1 : vector<4x256xf32>, i32 -> vector<4x256xf32>
    %cst_219 = arith.constant 0.000000e+00 : f32
    %392 = vector.shape_cast %385 : vector<1x256xi1> to vector<1x256xi1>
    %393 = vector.broadcast %392 : vector<1x256xi1> to vector<4x256xi1>
    %394 = vector.broadcast %cst_219 : f32 to vector<4x256xf32>
    %395 = arith.select %393, %391, %394 : vector<4x256xi1>, vector<4x256xf32>
    %c3_220 = arith.constant 3 : index
    %c0_221 = arith.constant 0 : index
    %c0_222 = arith.constant 0 : index
    %c0_223 = arith.constant 0 : index
    %396 = vector.load %arg3[%c3_220, %c0_221, %c0_222, %c0_223] : memref<4x9x4x1xf32, #tpu.memory_space<vmem>>, vector<1x1x4x1xf32>
    %397 = vector.shape_cast %396 : vector<1x1x4x1xf32> to vector<4x1xf32>
    %398 = vector.broadcast %397 : vector<4x1xf32> to vector<4x256xf32>
    %399 = arith.mulf %398, %390 : vector<4x256xf32>
    %c3_224 = arith.constant 3 : index
    %c3_225 = arith.constant 3 : index
    %c0_226 = arith.constant 0 : index
    %c0_227 = arith.constant 0 : index
    %400 = vector.load %arg3[%c3_224, %c3_225, %c0_226, %c0_227] : memref<4x9x4x1xf32, #tpu.memory_space<vmem>>, vector<1x1x4x1xf32>
    %401 = vector.shape_cast %400 : vector<1x1x4x1xf32> to vector<4x1xf32>
    %402 = vector.broadcast %401 : vector<4x1xf32> to vector<4x256xf32>
    %403 = arith.mulf %402, %381 : vector<4x256xf32>
    %404 = arith.addf %399, %403 : vector<4x256xf32>
    %c3_228 = arith.constant 3 : index
    %c6_229 = arith.constant 6 : index
    %c0_230 = arith.constant 0 : index
    %c0_231 = arith.constant 0 : index
    %405 = vector.load %arg3[%c3_228, %c6_229, %c0_230, %c0_231] : memref<4x9x4x1xf32, #tpu.memory_space<vmem>>, vector<1x1x4x1xf32>
    %406 = vector.shape_cast %405 : vector<1x1x4x1xf32> to vector<4x1xf32>
    %407 = vector.broadcast %406 : vector<4x1xf32> to vector<4x256xf32>
    %408 = arith.mulf %407, %395 : vector<4x256xf32>
    %409 = arith.addf %404, %408 : vector<4x256xf32>
    %c3_232 = arith.constant 3 : index
    %c1_233 = arith.constant 1 : index
    %c0_234 = arith.constant 0 : index
    %c0_235 = arith.constant 0 : index
    %410 = vector.load %arg3[%c3_232, %c1_233, %c0_234, %c0_235] : memref<4x9x4x1xf32, #tpu.memory_space<vmem>>, vector<1x1x4x1xf32>
    %411 = vector.shape_cast %410 : vector<1x1x4x1xf32> to vector<4x1xf32>
    %412 = vector.broadcast %411 : vector<4x1xf32> to vector<4x256xf32>
    %413 = arith.mulf %412, %390 : vector<4x256xf32>
    %c3_236 = arith.constant 3 : index
    %c4_237 = arith.constant 4 : index
    %c0_238 = arith.constant 0 : index
    %c0_239 = arith.constant 0 : index
    %414 = vector.load %arg3[%c3_236, %c4_237, %c0_238, %c0_239] : memref<4x9x4x1xf32, #tpu.memory_space<vmem>>, vector<1x1x4x1xf32>
    %415 = vector.shape_cast %414 : vector<1x1x4x1xf32> to vector<4x1xf32>
    %416 = vector.broadcast %415 : vector<4x1xf32> to vector<4x256xf32>
    %417 = arith.mulf %416, %381 : vector<4x256xf32>
    %418 = arith.addf %413, %417 : vector<4x256xf32>
    %c3_240 = arith.constant 3 : index
    %c7_241 = arith.constant 7 : index
    %c0_242 = arith.constant 0 : index
    %c0_243 = arith.constant 0 : index
    %419 = vector.load %arg3[%c3_240, %c7_241, %c0_242, %c0_243] : memref<4x9x4x1xf32, #tpu.memory_space<vmem>>, vector<1x1x4x1xf32>
    %420 = vector.shape_cast %419 : vector<1x1x4x1xf32> to vector<4x1xf32>
    %421 = vector.broadcast %420 : vector<4x1xf32> to vector<4x256xf32>
    %422 = arith.mulf %421, %395 : vector<4x256xf32>
    %423 = arith.addf %418, %422 : vector<4x256xf32>
    %c3_244 = arith.constant 3 : index
    %c2_245 = arith.constant 2 : index
    %c0_246 = arith.constant 0 : index
    %c0_247 = arith.constant 0 : index
    %424 = vector.load %arg3[%c3_244, %c2_245, %c0_246, %c0_247] : memref<4x9x4x1xf32, #tpu.memory_space<vmem>>, vector<1x1x4x1xf32>
    %425 = vector.shape_cast %424 : vector<1x1x4x1xf32> to vector<4x1xf32>
    %426 = vector.broadcast %425 : vector<4x1xf32> to vector<4x256xf32>
    %427 = arith.mulf %426, %390 : vector<4x256xf32>
    %c3_248 = arith.constant 3 : index
    %c5_249 = arith.constant 5 : index
    %c0_250 = arith.constant 0 : index
    %c0_251 = arith.constant 0 : index
    %428 = vector.load %arg3[%c3_248, %c5_249, %c0_250, %c0_251] : memref<4x9x4x1xf32, #tpu.memory_space<vmem>>, vector<1x1x4x1xf32>
    %429 = vector.shape_cast %428 : vector<1x1x4x1xf32> to vector<4x1xf32>
    %430 = vector.broadcast %429 : vector<4x1xf32> to vector<4x256xf32>
    %431 = arith.mulf %430, %381 : vector<4x256xf32>
    %432 = arith.addf %427, %431 : vector<4x256xf32>
    %c3_252 = arith.constant 3 : index
    %c8_253 = arith.constant 8 : index
    %c0_254 = arith.constant 0 : index
    %c0_255 = arith.constant 0 : index
    %433 = vector.load %arg3[%c3_252, %c8_253, %c0_254, %c0_255] : memref<4x9x4x1xf32, #tpu.memory_space<vmem>>, vector<1x1x4x1xf32>
    %434 = vector.shape_cast %433 : vector<1x1x4x1xf32> to vector<4x1xf32>
    %435 = vector.broadcast %434 : vector<4x1xf32> to vector<4x256xf32>
    %436 = arith.mulf %435, %395 : vector<4x256xf32>
    %437 = arith.addf %432, %436 : vector<4x256xf32>
    %c8_i32_256 = arith.constant 8 : i32
    %438 = vector.broadcast %c8_i32_256 : i32 to vector<1x256xi32>
    %439 = arith.cmpi sge, %0, %438 : vector<1x256xi32>
    %c8_i32_257 = arith.constant 8 : i32
    %440 = vector.broadcast %c8_i32_257 : i32 to vector<1x256xi32>
    %441 = arith.cmpi slt, %0, %440 : vector<1x256xi32>
    %c3_258 = arith.constant 3 : index
    %c0_259 = arith.constant 0 : index
    %c0_260 = arith.constant 0 : index
    %442 = vector.load %arg4[%c3_258, %c0_259, %c0_260] : memref<4x4x1xf32, #tpu.memory_space<vmem>>, vector<1x4x1xf32>
    %443 = vector.shape_cast %442 : vector<1x4x1xf32> to vector<4x1xf32>
    %444 = vector.broadcast %443 : vector<4x1xf32> to vector<4x256xf32>
    %445 = arith.addf %444, %423 : vector<4x256xf32>
    %c8_i32_261 = arith.constant 8 : i32
    %446 = tpu.dynamic_rotate %409 by %c8_i32_261 dim 1 : vector<4x256xf32>, i32 -> vector<4x256xf32>
    %cst_262 = arith.constant 0.000000e+00 : f32
    %447 = vector.shape_cast %439 : vector<1x256xi1> to vector<1x256xi1>
    %448 = vector.broadcast %447 : vector<1x256xi1> to vector<4x256xi1>
    %449 = vector.broadcast %cst_262 : f32 to vector<4x256xf32>
    %450 = arith.select %448, %446, %449 : vector<4x256xi1>, vector<4x256xf32>
    %451 = arith.addf %445, %450 : vector<4x256xf32>
    %c248_i32 = arith.constant 248 : i32
    %452 = tpu.dynamic_rotate %437 by %c248_i32 dim 1 : vector<4x256xf32>, i32 -> vector<4x256xf32>
    %cst_263 = arith.constant 0.000000e+00 : f32
    %453 = vector.shape_cast %441 : vector<1x256xi1> to vector<1x256xi1>
    %454 = vector.broadcast %453 : vector<1x256xi1> to vector<4x256xi1>
    %455 = vector.broadcast %cst_263 : f32 to vector<4x256xf32>
    %456 = arith.select %454, %452, %455 : vector<4x256xi1>, vector<4x256xf32>
    %457 = arith.addf %451, %456 : vector<4x256xf32>
    %c0_264 = arith.constant 0 : index
    %c12_265 = arith.constant 12 : index
    %458 = vector.load %arg5[%c0_264, %c12_265] : memref<16x16xf32, #tpu.memory_space<vmem>>, vector<16x4xf32>
    %cst_266 = arith.constant dense<0.000000e+00> : vector<16x256xf32>
    %459 = tpu.matmul %458, %457, %cst_266 {dimension_numbers = #tpu.dot_dimension_numbers<[1], [0], [0], [1], [0, 0, 1, 1], [], []>} : vector<16x4xf32>, vector<4x256xf32>, vector<16x256xf32> -> vector<16x256xf32>
    %c0_267 = arith.constant 0 : index
    %c0_268 = arith.constant 0 : index
    %c0_269 = arith.constant 0 : index
    %460 = vector.load %arg7[%c0_267, %c0_268, %c0_269] : memref<1x16x256xf32, #tpu.memory_space<vmem>>, vector<1x16x256xf32>
    %461 = vector.shape_cast %460 : vector<1x16x256xf32> to vector<16x256xf32>
    %462 = arith.addf %461, %459 : vector<16x256xf32>
    %c0_270 = arith.constant 0 : index
    %c0_271 = arith.constant 0 : index
    %c0_272 = arith.constant 0 : index
    %463 = vector.load %arg7[%c0_270, %c0_271, %c0_272] : memref<1x16x256xf32, #tpu.memory_space<vmem>>, vector<1x16x256xf32>
    %464 = vector.shape_cast %463 : vector<1x16x256xf32> to vector<16x256xf32>
    %465 = vector.shape_cast %462 : vector<16x256xf32> to vector<1x16x256xf32>
    tpu.vector_store %arg7[%c0_270, %c0_271, %c0_272], %465 {strides = array<i32>} : memref<1x16x256xf32, #tpu.memory_space<vmem>>, vector<1x16x256xf32>,
    %c0_273 = arith.constant 0 : index
    %c0_274 = arith.constant 0 : index
    %c0_275 = arith.constant 0 : index
    %466 = vector.load %arg7[%c0_273, %c0_274, %c0_275] : memref<1x16x256xf32, #tpu.memory_space<vmem>>, vector<1x16x256xf32>
    %467 = vector.shape_cast %466 : vector<1x16x256xf32> to vector<16x256xf32>
    %cst_276 = arith.constant 5.000000e-01 : f32
    %468 = vector.broadcast %cst_276 : f32 to vector<16x256xf32>
    %469 = arith.mulf %468, %467 : vector<16x256xf32>
    %cst_277 = arith.constant 0.707106769 : f32
    %470 = vector.broadcast %cst_277 : f32 to vector<16x256xf32>
    %471 = arith.mulf %467, %470 : vector<16x256xf32>
    %472 = math.erf %471 : vector<16x256xf32>
    %cst_278 = arith.constant 1.000000e+00 : f32
    %473 = vector.broadcast %cst_278 : f32 to vector<16x256xf32>
    %474 = arith.addf %473, %472 : vector<16x256xf32>
    %475 = arith.mulf %469, %474 : vector<16x256xf32>
    %c0_279 = arith.constant 0 : index
    %c0_280 = arith.constant 0 : index
    %c0_281 = arith.constant 0 : index
    %476 = vector.load %arg2[%c0_279, %c0_280, %c0_281] : memref<1x16x256xf32, #tpu.memory_space<vmem>>, vector<1x16x256xf32>
    %477 = vector.shape_cast %476 : vector<1x16x256xf32> to vector<16x256xf32>
    %478 = arith.mulf %475, %477 : vector<16x256xf32>
    %c0_282 = arith.constant 0 : index
    %c0_283 = arith.constant 0 : index
    %c0_284 = arith.constant 0 : index
    %479 = vector.load %arg7[%c0_282, %c0_283, %c0_284] : memref<1x16x256xf32, #tpu.memory_space<vmem>>, vector<1x16x256xf32>
    %480 = vector.shape_cast %479 : vector<1x16x256xf32> to vector<16x256xf32>
    %481 = vector.shape_cast %478 : vector<16x256xf32> to vector<1x16x256xf32>
    tpu.vector_store %arg7[%c0_282, %c0_283, %c0_284], %481 {strides = array<i32>} : memref<1x16x256xf32, #tpu.memory_space<vmem>>, vector<1x16x256xf32>,
    return
  }
  func.func @transform_0(%arg0: i32) -> (i32, i32) {
    %c0_i32 = arith.constant 0 : i32
    %c0_i32_0 = arith.constant 0 : i32
    %c0_i32_1 = arith.constant 0 : i32
    return %c0_i32, %c0_i32_0 : i32, i32
  }
  func.func @transform_1(%arg0: i32) -> (i32, i32, i32) {
    %c0_i32 = arith.constant 0 : i32
    %c0_i32_0 = arith.constant 0 : i32
    %c0_i32_1 = arith.constant 0 : i32
    return %arg0, %c0_i32, %c0_i32_0 : i32, i32, i32
  }
  func.func @transform_2(%arg0: i32) -> (i32, i32, i32, i32) {
    %c0_i32 = arith.constant 0 : i32
    %c0_i32_0 = arith.constant 0 : i32
    %c0_i32_1 = arith.constant 0 : i32
    %c0_i32_2 = arith.constant 0 : i32
    %c0_i32_3 = arith.constant 0 : i32
    return %c0_i32, %c0_i32_0, %c0_i32_1, %c0_i32_2 : i32, i32, i32, i32
  }
  func.func @transform_3(%arg0: i32) -> (i32, i32, i32) {
    %c0_i32 = arith.constant 0 : i32
    %c0_i32_0 = arith.constant 0 : i32
    %c0_i32_1 = arith.constant 0 : i32
    %c0_i32_2 = arith.constant 0 : i32
    return %c0_i32, %c0_i32_0, %c0_i32_1 : i32, i32, i32
  }
  func.func @transform_4(%arg0: i32) -> (i32, i32) {
    %c0_i32 = arith.constant 0 : i32
    %c0_i32_0 = arith.constant 0 : i32
    %c0_i32_1 = arith.constant 0 : i32
    return %c0_i32, %c0_i32_0 : i32, i32
  }
  func.func @transform_5(%arg0: i32) -> (i32, i32) {
    %c0_i32 = arith.constant 0 : i32
    %c0_i32_0 = arith.constant 0 : i32
    %c0_i32_1 = arith.constant 0 : i32
    return %c0_i32, %c0_i32_0 : i32, i32
  }
  func.func @transform_6(%arg0: i32) -> (i32, i32, i32) {
    %c0_i32 = arith.constant 0 : i32
    %c0_i32_0 = arith.constant 0 : i32
    %c0_i32_1 = arith.constant 0 : i32
    return %arg0, %c0_i32, %c0_i32_0 : i32, i32, i32
  }
}

</mosaic_0001>

<bundles_post_ra>
// kernel: tpu_custom_call.1
= control target key start
LH: loop header
LB: loop body
LE: loop exit
PB: predicated region body
PF: predicated region fallthrough
CT: control target
= control target key end

     0   :  { %11 = vsyncpa [#allocation3], 0  ;;  %s3217_s0 = inlined_call_operand.vmem [shape: s32[2,256], index: 0, kind: input, shape index: {}]   ;;  %s3218_s1 = inlined_call_operand.vmem [shape: f32[2,16,256], index: 1, kind: input, shape index: {}]   ;;  %s3219_s2 = inlined_call_operand.vmem [shape: f32[4,9,4,1], index: 2, kind: input, shape index: {}]   ;;  %s3220_s3 = inlined_call_operand.vmem [shape: f32[4,4,1], index: 3, kind: input, shape index: {}]   ;;  %s3221_s4 = inlined_call_operand.vmem [shape: f32[16,16], index: 4, kind: input, shape index: {}]   ;;  %s3222_s5 = inlined_call_operand.vmem [shape: f32[16,1], index: 5, kind: input, shape index: {}]   ;;  %s3223_s6 = inlined_call_operand.hbm [shape: f32[2,16,256], index: 6, kind: output, shape index: {}]  }
   0x1   :  { %13 = vsyncpa [#allocation3 + $0x1], 0  ;;  %s2200_s21 = smov 0   ;;  %s2202_s22 = smov 0  }
   0x2   :  { %s2204_s23 = smov 0   ;;  %s2206_s24 = smov 0  }
   0x3 LB: > { %s2221_s25 = sadd.s32 4294967295, %s2145_s24   ;;  %s1914_s26 = sadd.s32 4294967294, %s2145_s24   ;;  %s2145_s24 = sphi %s2206_s24, %s3264_s24   ;;  %s2141_s23 = sphi %s2204_s23, %s3263_s23   ;;  %s2137_s22 = sphi %s2202_s22, %s3262_s22   ;;  %s2133_s21 = sphi %s2200_s21, %s3261_s21  }
   0x4   : > { %s2225_s27 = sadd.s32 1, %s2145_s24   ;;  %s157_s28 = sadd.s32 1, %s2141_s23 }
   0x5   : > { %s154_s29 = ssub.s32 %s2145_s24, %s2225_s27  ;;  %p167_p0 = scmp.ne.s32.totalorder %s2141_s23, %s2137_s22 }
   0x6   : > { %p155_p1 = scmp.eq.s32.totalorder %s154_s29, 0  ;;  %p168_p2 = scmp.eq.s32.totalorder %s2221_s25, 1 }
   0x7   : > { %p173_p3 = scmp.ne.s32.totalorder %s2137_s22, %s2133_s21  ;;  %p174_p4 = scmp.eq.s32.totalorder %s1914_s26, 1 }
   0x8   : > { %s2236_s30 = scalar_select %p155_p1, %s2141_s23, %s157_s28  }
   0x9   : > { %p2238_p5 = por %p168_p2, %p167_p0  ;;  %p2242_p6 = por %p174_p4, %p173_p3 }
   0xa   : > { %p1917_p7 = scmp.ge.s32.totalorder %s2145_s24, 1  ;;  %p215_p8 = scmp.lt.s32.totalorder %s2145_s24, 3 }
   0xc   : > { %p216_p9 = pnand %p1917_p7, %p215_p8 }
   0xd   : > { %p245_p10 = scmp.lt.s32.totalorder (!%p216_p9), %s2221_s25, 1  ;;  %v2147_v0 = vmov (!%p216_p9), 0   ;;  %s2148_s14 = smov (!%p216_p9), 16   ;;  %v2266_v5 = vld [vmem:[%s3217_s0 + $0x1] ss:$2 sm:$0x3] (!%p216_p9)  ;;  %v261_v6 = vlaneseq (!%p216_p9) }
   0xe   : > { %219 = sbr.rel (%p216_p9) target bundleno = 1208 (0x4b8), region = 44  ;;  %2072 = vset.pattern.permute.xlu1 (!%p216_p9), %v2147_v0  ;;  %2071 = vset.pattern.permute.xlu0 (!%p216_p9), %v2147_v0  ;;  %s2149_s15 = smov (!%p216_p9), 112   ;;  %v574_v7 = vand.u32 (!%p216_p9), 1, %v2266_v5  ;;  %v2313_v35 = vld [vmem:[%s3217_s0] ss:$2 sm:$0x3] (!%p216_p9) }
   0xf   : > { %v268_v8 = vshrl.u32 (!%p216_p9), %v261_v6, 7  ;;  %v2274_v12 = vand.u32 (!%p216_p9), 127, %v261_v6  ;;  %s3228_s18 = smov (!%p216_p9), 127   ;;  %s2151_s19 = smov (!%p216_p9), 1   ;;  %v615_v36 = vand.u32 (!%p216_p9), 1, %v2313_v35  ;;  %v1016_v18 = vand.u32 (!%p216_p9), 2, %v2313_v35 }
  0x10   : > { %vm575_vm0 = vcmp.eq.s32.totalorder (!%p216_p9), %v574_v7, 0  ;;  %s2152_s28 = smov (!%p216_p9), 96   ;;  %s2153_s29 = smov (!%p216_p9), 32   ;;  %v1955_v43 = vld [vmem:[%s3219_s2 + $0x5c] sm:$0xf] (!%p216_p9) }
  0x11   : > { %v2269_v9 = vsub.s32 (!%p216_p9), 0, %v268_v8  ;;  %v2271_v10 = vsub.s32 (!%p216_p9), 1, %v268_v8  ;;  %v576_v11 = vsel (!%p216_p9), %vm575_vm0, 1, %v2147_v0  ;;  %vm263_vm1 = vcmp.lt.s32.totalorder (!%p216_p9), %v2274_v12, 16  ;;  %s2156_s20 = smov (!%p216_p9), 64   ;;  %s3249_s16 = smov (!%p216_p9), 2  }
  0x12   : > { %vm283_vm2 = vcmp.lt.s32.totalorder (!%p216_p9), %v2274_v12, 112  ;;  %vm616_vm5 = vcmp.eq.s32.totalorder (!%p216_p9), %v615_v36, 0  ;;  %vm427_vm6 = vcmp.lt.s32.totalorder (!%p216_p9), %v2274_v12, 127  ;;  %vm405_vm7 = vcmp.lt.s32.totalorder (!%p216_p9), %v2274_v12, 1  ;;  %s3250_s17 = smov (!%p216_p9), 126   ;;  %s2160_s11 = smov (!%p216_p9), 120  }
  0x13   : > { %v580_v13 = vrot.slane (!%p216_p9), %v576_v11, %v2269_v9  ;;  %v584_v14 = vrot.slane (!%p216_p9), %v576_v11, %v2271_v10  ;;  %v617_v37 = vsel (!%p216_p9), %vm616_vm5, 1, %v2147_v0  ;;  %vm670_vm11 = vcmp.lt.s32.totalorder (!%p216_p9), %v2274_v12, 96 }
  0x14   : > { %v621_v38 = vrot.slane (!%p216_p9), %v617_v37, %v2269_v9  ;;  %v625_v39 = vrot.slane (!%p216_p9), %v617_v37, %v2271_v10  ;;  %vm650_vm12 = vcmp.lt.s32.totalorder (!%p216_p9), %v2274_v12, 32  ;;  %vm1017_vm15 = vcmp.eq.s32.totalorder (!%p216_p9), %v1016_v18, 0 }
  0x15   : > { %s246_s9 = scalar_select %p245_p10, %s2221_s25, 1  ;;  %vm2280_vm3 = vcmp.eq.s32.totalorder %v580_v13, 1  ;;  %vm2284_vm4 = vcmp.eq.s32.totalorder %v584_v14, 1  ;;  %vm794_vm0 = vcmp.lt.s32.totalorder %v2274_v12, 2 }
  0x16   : > { %vm2321_vm8 = vcmp.eq.s32.totalorder %v621_v38, 1  ;;  %vm2325_vm9 = vcmp.eq.s32.totalorder %v625_v39, 1 }
  0x17   : > { %s1981_s10 = sshll.u32 %s246_s9, 5  ;;  %s3224_s9 = smov 126  }
  0x18   : > { %s2255_s13 = scalar_lea.vmem %s3218_s1, %s1981_s10  ;;  %s3226_s10 = smov 2  }
  0x19   : > { %v1323_v1 = vld [vmem:[%s2255_s13 + $0x10] sm:$0xf0]  ;;  %v1324_v2 = vld [vmem:[%s2255_s13 + $0x18] sm:$0xf0]  ;;  %v942_v33 = vld [vmem:[%s2255_s13 + $0x18] sm:$0xf] }
  0x1a   : > { %v1327_v3 = vrot.slane %v1323_v1, 4  ;;  %v1328_v4 = vrot.slane %v1324_v2, 4  ;;  %v941_v34 = vld [vmem:[%s2255_s13 + $0x10] sm:$0xf]  ;;  %v2360_v8 = vld [vmem:[%s2255_s13 + $0x8] sm:$0xf0] }
  0x1b   : > { %v2363_v11 = vld [vmem:[%s2255_s13] sm:$0xf0]  ;;  %v559_v13 = vrot.slane %v2360_v8, 4 }
  0x1c   : > { %1337 = vrot.lane.b32.xlu1 %v1327_v3, %s2148_s14  ;;  %1331 = vrot.lane.b32.xlu0 %v1327_v3, %s2149_s15  ;;  %v558_v14 = vrot.slane %v2363_v11, 4 }
  0x20   : > { %1339 = vrot.lane.b32.xlu1 %v1328_v4, %s2148_s14  ;;  %1333 = vrot.lane.b32.xlu0 %v1328_v4, %s2149_s15 }
  0x8e   : > { %v1338_v15 = vpop.permute.xlu1 %1337  ;;  %v1332_v16 = vpop.permute.xlu0 %1331 }
  0x92   : > { %v1340_v19 = vpop.permute.xlu1 %1339  ;;  %v1334_v20 = vpop.permute.xlu0 %1333 }
  0x93   : > { %v1341_v21 = vsel %vm263_vm1, %v1338_v15, %v1340_v19  ;;  %v1342_v22 = vsel %vm263_vm1, %v1340_v19, %v1338_v15  ;;  %v1335_v23 = vsel %vm283_vm2, %v1332_v16, %v1334_v20  ;;  %v1336_v24 = vsel %vm283_vm2, %v1334_v20, %v1332_v16 }
  0x94   : > { %v1343_v25 = vsel %vm2280_vm3, %v1335_v23, %v1342_v22  ;;  %v1344_v26 = vsel %vm2284_vm4, %v1336_v24, %v1341_v21  ;;  %v987_v15 = vand.u32 2, %v2266_v5 }
  0x95   : > { %v1347_v27 = vrot.slane %v1343_v25, 4  ;;  %v1348_v28 = vrot.slane %v1344_v26, 4 }
  0x96   : > { %vm988_vm10 = vcmp.eq.s32.totalorder %v987_v15, 0 }
  0x97   : > { %v1352_v29 = vmax.f32 %v1324_v2, %v1348_v28  ;;  %v1351_v30 = vmax.f32 %v1323_v1, %v1347_v27  ;;  %v989_v16 = vsel %vm988_vm10, 1, %v2147_v0 }
  0x98   : > { %v993_v19 = vrot.slane %v989_v16, %v2269_v9  ;;  %v997_v20 = vrot.slane %v989_v16, %v2271_v10 }
  0x99   : > { %v1356_v31 = vrot.slane %v1352_v29, 4  ;;  %v1355_v32 = vrot.slane %v1351_v30, 4 }
  0x9a   : > { %vm2379_vm13 = vcmp.eq.s32.totalorder %v993_v19, 1  ;;  %vm2383_vm14 = vcmp.eq.s32.totalorder %v997_v20, 1 }
  0x9b   : > { %1361 = vrot.lane.b32.xlu1 %v1356_v31, %s3228_s18  ;;  %1359 = vrot.lane.b32.xlu0 %v1355_v32, %s3228_s18 }
  0x9f   : > { %1367 = vrot.lane.b32.xlu1 %v1356_v31, %s2151_s19  ;;  %1365 = vrot.lane.b32.xlu0 %v1355_v32, %s2151_s19 }
  0xa3   : > { %945 = vrot.lane.b32.xlu1 %v942_v33, %s2149_s15  ;;  %943 = vrot.lane.b32.xlu0 %v941_v34, %s2149_s15 }
  0xa7   : > { %951 = vrot.lane.b32.xlu1 %v942_v33, %s2148_s14  ;;  %949 = vrot.lane.b32.xlu0 %v941_v34, %s2148_s14 }
 0x10d   : > { %v1362_v40 = vpop.permute.xlu1 %1361  ;;  %v1360_v41 = vpop.permute.xlu0 %1359 }
 0x10e   : > { %v1363_v46 = vsel %vm427_vm6, %v1360_v41, %v1362_v40  ;;  %v1364_v47 = vsel %vm427_vm6, %v1362_v40, %v1360_v41 }
 0x111   : > { %v1368_v44 = vpop.permute.xlu1 %1367  ;;  %v1366_v45 = vpop.permute.xlu0 %1365 }
 0x112   : > { %v1369_v48 = vsel %vm405_vm7, %v1366_v45, %v1368_v44  ;;  %v1370_v49 = vsel %vm405_vm7, %v1368_v44, %v1366_v45 }
 0x113   : > { %v1371_v50 = vsel %vm2321_vm8, %v1363_v46, %v1370_v49  ;;  %v1372_v51 = vsel %vm2325_vm9, %v1364_v47, %v1369_v48 }
 0x114   : > { %v1375_v52 = vrot.slane %v1371_v50, 4  ;;  %v1376_v53 = vrot.slane %v1372_v51, 4 }
 0x115   : > { %v946_v54 = vpop.permute.xlu1 %945  ;;  %v944_v55 = vpop.permute.xlu0 %943 }
 0x116   : > { %v1380_v56 = vmax.f32 %v1352_v29, %v1376_v53  ;;  %v1379_v57 = vmax.f32 %v1351_v30, %v1375_v52  ;;  %v947_v58 = vsel %vm283_vm2, %v944_v55, %v946_v54  ;;  %v948_v59 = vsel %vm283_vm2, %v946_v54, %v944_v55 }
 0x118   : > { %v1384_v60 = vrot.slane %v1380_v56, 4  ;;  %v1383_v61 = vrot.slane %v1379_v57, 4 }
 0x119   : > { %v952_v62 = vpop.permute.xlu1 %951  ;;  %v950_v63 = vpop.permute.xlu0 %949 }
 0x11a   : > { %1389 = vrot.lane.b32.xlu1 %v1384_v60, %s2152_s28  ;;  %1387 = vrot.lane.b32.xlu0 %v1383_v61, %s2152_s28  ;;  %v953_v1 = vsel %vm263_vm1, %v950_v63, %v952_v62  ;;  %v954_v2 = vsel %vm263_vm1, %v952_v62, %v950_v63 }
 0x11b   : > { %v955_v3 = vsel %vm2280_vm3, %v947_v58, %v954_v2  ;;  %v956_v4 = vsel %vm2284_vm4, %v948_v59, %v953_v1 }
 0x11c   : > { %v957_v6 = vmax.f32 %v941_v34, %v955_v3  ;;  %v958_v7 = vmax.f32 %v942_v33, %v956_v4 }
 0x11e   : > { %1395 = vrot.lane.b32.xlu1 %v1384_v60, %s2153_s29  ;;  %1393 = vrot.lane.b32.xlu0 %v1383_v61, %s2153_s29 }
 0x122   : > { %959 = vrot.lane.b32.xlu0 %v957_v6, %s3228_s18  ;;  %961 = vrot.lane.b32.xlu1 %v958_v7, %s3228_s18 }
 0x126   : > { %965 = vrot.lane.b32.xlu0 %v957_v6, %s2151_s19  ;;  %967 = vrot.lane.b32.xlu1 %v958_v7, %s2151_s19 }
 0x12a   : > { %564 = vrot.lane.b32.xlu1 %v559_v13, %s2149_s15  ;;  %562 = vrot.lane.b32.xlu0 %v558_v14, %s2149_s15 }
 0x12e   : > { %570 = vrot.lane.b32.xlu1 %v559_v13, %s2148_s14  ;;  %568 = vrot.lane.b32.xlu0 %v558_v14, %s2148_s14  ;;  %v1018_v14 = vsel %vm1017_vm15, 1, %v2147_v0  ;;  %vm256_vm15 = vcmp.lt.s32.totalorder %v2266_v5, 15 }
 0x12f   : > { %v1022_v15 = vrot.slane %v1018_v14, %v2269_v9  ;;  %v1026_v16 = vrot.slane %v1018_v14, %v2271_v10 }
 0x131   : > { %vm2459_vm5 = vcmp.eq.s32.totalorder %v1026_v16, 1  ;;  %v1950_v16 = vld [vmem:[%s3219_s2 + $0x60] sm:$0xf] }
 0x18c   : > { %v1390_v21 = vpop.permute.xlu1 %1389  ;;  %v1388_v22 = vpop.permute.xlu0 %1387 }
 0x18d   : > { %v1391_v27 = vsel %vm670_vm11, %v1388_v22, %v1390_v21  ;;  %v1392_v28 = vsel %vm670_vm11, %v1390_v21, %v1388_v22  ;;  %v1963_v21 = vld [vmem:[%s3219_s2 + $0x78] sm:$0xf]  ;;  %v1962_v22 = vld [vmem:[%s3219_s2 + $0x6c] sm:$0xf] }
 0x190   : > { %v1396_v25 = vpop.permute.xlu1 %1395  ;;  %v1394_v26 = vpop.permute.xlu0 %1393 }
 0x191   : > { %v1397_v29 = vsel %vm650_vm12, %v1394_v26, %v1396_v25  ;;  %v1398_v30 = vsel %vm650_vm12, %v1396_v25, %v1394_v26 }
 0x192   : > { %v1399_v31 = vsel %vm2379_vm13, %v1391_v27, %v1398_v30  ;;  %v1400_v32 = vsel %vm2383_vm14, %v1392_v28, %v1397_v29 }
 0x193   : > { %v1403_v33 = vrot.slane %v1399_v31, 4  ;;  %v1404_v34 = vrot.slane %v1400_v32, 4 }
 0x194   : > { %v962_v36 = vpop.permute.xlu1 %961  ;;  %v960_v37 = vpop.permute.xlu0 %959 }
 0x195   : > { %v2399_v38 = vmax.f32 %v1380_v56, %v1404_v34  ;;  %v2401_v39 = vmax.f32 %v1379_v57, %v1403_v33  ;;  %v963_v48 = vsel %vm427_vm6, %v960_v37, %v962_v36  ;;  %v964_v49 = vsel %vm427_vm6, %v962_v36, %v960_v37 }
 0x197   : > { %v1412_v40 = vrot.slane %v2399_v38, 4  ;;  %v1411_v41 = vrot.slane %v2401_v39, 4 }
 0x198   : > { %v968_v44 = vpop.permute.xlu1 %967  ;;  %v966_v45 = vpop.permute.xlu0 %965 }
 0x199   : > { %v969_v46 = vsel %vm405_vm7, %v966_v45, %v968_v44  ;;  %v970_v47 = vsel %vm405_vm7, %v968_v44, %v966_v45  ;;  %1417 = vrot.lane.b32.xlu1 %v1412_v40, %s3224_s9  ;;  %1415 = vrot.lane.b32.xlu0 %v1411_v41, %s3224_s9 }
 0x19a   : > { %v972_v52 = vsel %vm2325_vm9, %v964_v49, %v969_v46  ;;  %v971_v53 = vsel %vm2321_vm8, %v963_v48, %v970_v47  ;;  %v299_v46 = vld [vmem:[%s3219_s2] sm:$0xf]  ;;  %v1922_v47 = vld [vmem:[%s3219_s2 + $0xc] sm:$0xf] }
 0x19b   : > { %v974_v56 = vmax.f32 %v958_v7, %v972_v52  ;;  %v973_v57 = vmax.f32 %v957_v6, %v971_v53  ;;  %v1929_v52 = vld [vmem:[%s3219_s2 + $0x20] sm:$0xf]  ;;  %v1928_v53 = vld [vmem:[%s3219_s2 + $0x14] sm:$0xf] }
 0x19c   : > { %v565_v50 = vpop.permute.xlu1 %564  ;;  %v563_v51 = vpop.permute.xlu0 %562 }
 0x19d   : > { %1423 = vrot.lane.b32.xlu1 %v1412_v40, %s3226_s10  ;;  %1421 = vrot.lane.b32.xlu0 %v1411_v41, %s3226_s10  ;;  %v566_v54 = vsel %vm283_vm2, %v563_v51, %v565_v50  ;;  %v567_v55 = vsel %vm283_vm2, %v565_v50, %v563_v51 }
 0x1a0   : > { %v571_v58 = vpop.permute.xlu1 %570  ;;  %v569_v59 = vpop.permute.xlu0 %568 }
 0x1a1   : > { %v572_v60 = vsel %vm263_vm1, %v569_v59, %v571_v58  ;;  %v573_v61 = vsel %vm263_vm1, %v571_v58, %v569_v59  ;;  %977 = vrot.lane.b32.xlu1 %v974_v56, %s2152_s28  ;;  %975 = vrot.lane.b32.xlu0 %v973_v57, %s2152_s28  ;;  %v1935_v58 = vld [vmem:[%s3219_s2 + $0x30] sm:$0xf]  ;;  %v1934_v59 = vld [vmem:[%s3219_s2 + $0x24] sm:$0xf] }
 0x1a2   : > { %v587_v62 = vsel %vm2280_vm3, %v566_v54, %v573_v61  ;;  %v588_v63 = vsel %vm2284_vm4, %v567_v55, %v572_v60  ;;  %vm816_vm3 = vcmp.lt.s32.totalorder %v2274_v12, 126  ;;  %vm2455_vm4 = vcmp.eq.s32.totalorder %v1022_v15, 1  ;;  %v2528_v54 = vld [vmem:[%s2255_s13 + $0x8] sm:$0xf]  ;;  %v2531_v55 = vld [vmem:[%s2255_s13] sm:$0xf] }
 0x1a3   : > { %v591_v1 = vrot.slane %v587_v62, 4  ;;  %v592_v2 = vrot.slane %v588_v63, 4  ;;  %v1940_v62 = vld [vmem:[%s3219_s2 + $0x2c] sm:$0xf]  ;;  %v1936_v63 = vld [vmem:[%s3219_s2 + $0x3c] sm:$0xf] }
 0x1a4   : > { %v1954_v15 = vld [vmem:[%s3219_s2 + $0x50] sm:$0xf] }
 0x1a5   : > { %983 = vrot.lane.b32.xlu1 %v974_v56, %s2153_s29  ;;  %981 = vrot.lane.b32.xlu0 %v973_v57, %s2153_s29  ;;  %v2438_v3 = vmax.f32 %v2363_v11, %v591_v1  ;;  %v2441_v4 = vmax.f32 %v2360_v8, %v592_v2 }
 0x1a7   : > { %v599_v6 = vrot.slane %v2438_v3, 4  ;;  %v600_v17 = vrot.slane %v2441_v4, 4 }
 0x1a9   : > { %603 = vrot.lane.b32.xlu0 %v599_v6, %s3228_s18  ;;  %605 = vrot.lane.b32.xlu1 %v600_v17, %s3228_s18 }
 0x1ad   : > { %609 = vrot.lane.b32.xlu0 %v599_v6, %s2151_s19  ;;  %611 = vrot.lane.b32.xlu1 %v600_v17, %s2151_s19  ;;  %v1948_v6 = vld [vmem:[%s3219_s2 + $0x48] sm:$0xf]  ;;  %v1941_v17 = vld [vmem:[%s3219_s2 + $0x38] sm:$0xf] }
 0x20b   : > { %v1418_v7 = vpop.permute.xlu1 %1417  ;;  %v1416_v11 = vpop.permute.xlu0 %1415 }
 0x20c   : > { %v1419_v36 = vsel %vm816_vm3, %v1416_v11, %v1418_v7  ;;  %v1420_v37 = vsel %vm816_vm3, %v1418_v7, %v1416_v11 }
 0x20f   : > { %v1424_v13 = vpop.permute.xlu1 %1423  ;;  %v1422_v8 = vpop.permute.xlu0 %1421 }
 0x210   : > { %v1425_v25 = vsel %vm794_vm0, %v1422_v8, %v1424_v13  ;;  %v1426_v26 = vsel %vm794_vm0, %v1424_v13, %v1422_v8  ;;  %v1942_v13 = vld [vmem:[%s3219_s2 + $0x44] sm:$0xf]  ;;  %v1949_v8 = vld [vmem:[%s3219_s2 + $0x54] sm:$0xf] }
 0x211   : > { %v1427_v44 = vsel %vm2455_vm4, %v1419_v36, %v1426_v26  ;;  %v1428_v23 = vsel %vm2459_vm5, %v1420_v37, %v1425_v25 }
 0x212   : > { %v1431_v24 = vrot.slane %v1427_v44, 4  ;;  %v1432_v45 = vrot.slane %v1428_v23, 4 }
 0x213   : > { %v978_v19 = vpop.permute.xlu1 %977  ;;  %v976_v20 = vpop.permute.xlu0 %975 }
 0x214   : > { %v979_v29 = vsel %vm670_vm11, %v976_v20, %v978_v19  ;;  %v980_v30 = vsel %vm670_vm11, %v978_v19, %v976_v20  ;;  %v2506_v48 = vmax.f32 %v2401_v39, %v1431_v24  ;;  %v2509_v49 = vmax.f32 %v2399_v38, %v1432_v45  ;;  %v1927_v39 = vld [vmem:[%s3219_s2 + $0x8] sm:$0xf]  ;;  %v1923_v38 = vld [vmem:[%s3219_s2 + $0x18] sm:$0xf] }
 0x216   : > { %v1439_v50 = vrot.slane %v2506_v48, 4  ;;  %v1440_v51 = vrot.slane %v2509_v49, 4 }
 0x217   : > { %v984_v27 = vpop.permute.xlu1 %983  ;;  %v982_v28 = vpop.permute.xlu0 %981 }
 0x218   : > { %v985_v31 = vsel %vm650_vm12, %v982_v28, %v984_v27  ;;  %v986_v32 = vsel %vm650_vm12, %v984_v27, %v982_v28  ;;  %v1956_v27 = vld [vmem:[%s3219_s2 + $0x68] sm:$0xf] }
 0x219   : > { %v1000_v33 = vsel %vm2379_vm13, %v979_v29, %v986_v32  ;;  %v1001_v34 = vsel %vm2383_vm14, %v980_v30, %v985_v31  ;;  %vm255_vm14 = vcmp.ge.s32.totalorder %v2266_v5, 1 }
 0x21a   : > { %v2483_v40 = vmax.f32 %v973_v57, %v1000_v33  ;;  %v2485_v41 = vmax.f32 %v974_v56, %v1001_v34 }
 0x21b   : > { %v606_v56 = vpop.permute.xlu1 %605  ;;  %v604_v57 = vpop.permute.xlu0 %603 }
 0x21c   : > { %1004 = vrot.lane.b32.xlu0 %v2483_v40, %s3224_s9  ;;  %1006 = vrot.lane.b32.xlu1 %v2485_v41, %s3224_s9  ;;  %v607_v1 = vsel %vm427_vm6, %v604_v57, %v606_v56  ;;  %v608_v7 = vsel %vm427_vm6, %v606_v56, %v604_v57  ;;  %s2158_s9 = smov 4  }
 0x21f   : > { %v612_v60 = vpop.permute.xlu1 %611  ;;  %v610_v61 = vpop.permute.xlu0 %609 }
 0x220   : > { %1010 = vrot.lane.b32.xlu0 %v2483_v40, %s3226_s10  ;;  %1012 = vrot.lane.b32.xlu1 %v2485_v41, %s3226_s10  ;;  %v614_v2 = vsel %vm405_vm7, %v612_v60, %v610_v61  ;;  %v613_v11 = vsel %vm405_vm7, %v610_v61, %v612_v60 }
 0x221   : > { %v628_v18 = vsel %vm2321_vm8, %v607_v1, %v614_v2  ;;  %v629_v42 = vsel %vm2325_vm9, %v608_v7, %v613_v11  ;;  %vm1039_vm9 = vcmp.lt.s32.totalorder %v2274_v12, 64 }
 0x222   : > { %v632_v14 = vrot.slane %v628_v18, 4  ;;  %v633_v19 = vrot.slane %v629_v42, 4 }
 0x224   : > { %302 = vperm.xlu0 %2071, %v299_v46   ;;  %311 = vperm.xlu1 %2072, %v1922_v47   ;;  %v636_v20 = vmax.f32 %v2438_v3, %v632_v14  ;;  %v637_v25 = vmax.f32 %v2441_v4, %v633_v19  ;;  %v266_v14 = vsel %vm255_vm14, 1, %v2147_v0  ;;  %v1925_v19 = vld [vmem:[%s3219_s2 + $0x10] sm:$0xf] }
 0x226   : > { %v2588_v26 = vrot.slane %v636_v20, 4  ;;  %v2595_v28 = vrot.slane %v637_v25, 4  ;;  %v1926_v20 = vld [vmem:[%s3219_s2 + $0x1c] sm:$0xf] }
 0x228   : > { %1443 = vrot.lane.b32.xlu0 %v1439_v50, %s2156_s20  ;;  %1445 = vrot.lane.b32.xlu1 %v1440_v51, %s2156_s20 }
 0x22c   : > { %364 = vperm.xlu0 %2071, %v1927_v39   ;;  %322 = vperm.xlu1 %2072, %v1923_v38  }
 0x230   : > { %384 = vperm.xlu0 %2071, %v1929_v52   ;;  %373 = vperm.xlu1 %2072, %v1928_v53  }
 0x234   : > { %259 = vrot.lane.b32.xlu0 %v2528_v54, %s2148_s14  ;;  %257 = vrot.lane.b32.xlu1 %v2531_v55, %s2148_s14 }
 0x238   : > { %281 = vrot.lane.b32.xlu0 %v2528_v54, %s2149_s15  ;;  %279 = vrot.lane.b32.xlu1 %v2531_v55, %s2149_s15 }
 0x23c   : > { %699 = vperm.xlu0 %2071, %v1935_v58   ;;  %690 = vperm.xlu1 %2072, %v1934_v59  }
 0x240   : > { %752 = vperm.xlu0 %2071, %v1940_v62   ;;  %710 = vperm.xlu1 %2072, %v1936_v63  }
 0x244   : > { %1072 = vperm.xlu0 %2071, %v1948_v6   ;;  %761 = vperm.xlu1 %2072, %v1941_v17  }
 0x248   : > { %772 = vperm.xlu0 %2071, %v1942_v13   ;;  %1081 = vperm.xlu1 %2072, %v1949_v8   ;;  %v1970_v13 = vld [vmem:[%s3219_s2 + $0x8c] sm:$0xf]  ;;  %v1924_v8 = vld [vmem:[%s3219_s2 + $0x4] sm:$0xf] }
 0x24c   : > { %1134 = vperm.xlu0 %2071, %v1954_v15   ;;  %1092 = vperm.xlu1 %2072, %v1950_v16   ;;  %v286_v16 = vsel %vm256_vm15, 1, %v2147_v0 }
 0x250   : > { %646 = vrot.lane.b32.xlu0 %v2588_v26, %s2153_s29  ;;  %1143 = vperm.xlu1 %2072, %v1955_v43   ;;  %v270_v43 = vrot.slane %v266_v14, %v2269_v9 }
 0x254   : > { %1154 = vperm.xlu0 %2071, %v1956_v27   ;;  %648 = vrot.lane.b32.xlu1 %v2595_v28, %s2153_s29  ;;  %s2162_s29 = smov 116  }
 0x258   : > { %668 = vrot.lane.b32.xlu0 %v2595_v28, %s2152_s28  ;;  %666 = vrot.lane.b32.xlu1 %v2588_v26, %s2152_s28 }
 0x28e   : > { %v1007_v3 = vpop.permute.xlu1 %1006  ;;  %v1005_v4 = vpop.permute.xlu0 %1004 }
 0x28f   : > { %v1008_v31 = vsel %vm816_vm3, %v1005_v4, %v1007_v3  ;;  %v1009_v32 = vsel %vm816_vm3, %v1007_v3, %v1005_v4  ;;  %v290_v3 = vrot.slane %v286_v16, %v2269_v9  ;;  %v393_v4 = vld [vmem:[%s3220_s3] sm:$0xf] }
 0x292   : > { %v1013_v29 = vpop.permute.xlu1 %1012  ;;  %v1011_v30 = vpop.permute.xlu0 %1010 }
 0x293   : > { %v1014_v33 = vsel %vm794_vm0, %v1011_v30, %v1013_v29  ;;  %v1015_v34 = vsel %vm794_vm0, %v1013_v29, %v1011_v30  ;;  %v1937_v29 = vld [vmem:[%s3219_s2 + $0x28] sm:$0xf]  ;;  %v274_v30 = vrot.slane %v266_v14, %v2271_v10 }
 0x294   : > { %v1029_v36 = vsel %vm2455_vm4, %v1008_v31, %v1015_v34  ;;  %v1030_v37 = vsel %vm2459_vm5, %v1009_v32, %v1014_v33  ;;  %vm275_vm4 = vcmp.eq.s32.totalorder %v270_v43, 1  ;;  %v294_v34 = vrot.slane %v286_v16, %v2271_v10 }
 0x295   : > { %v2616_v44 = vmax.f32 %v2483_v40, %v1029_v36  ;;  %v2619_v23 = vmax.f32 %v2485_v41, %v1030_v37  ;;  %v1449_v40 = vand.u32 4, %v2266_v5  ;;  %v1964_v41 = vld [vmem:[%s3219_s2 + $0x84] sm:$0xf]  ;;  %vm295_vm5 = vcmp.eq.s32.totalorder %v290_v3, 1 }
 0x297   : > { %1037 = vrot.lane.b32.xlu0 %v2619_v23, %s2156_s20  ;;  %1035 = vrot.lane.b32.xlu1 %v2616_v44, %s2156_s20  ;;  %vm1450_vm8 = vcmp.eq.s32.totalorder %v1449_v40, 0  ;;  %s2157_s20 = smov 124  }
 0x298   : > { %v1451_v24 = vsel %vm1450_vm8, 1, %v2147_v0  ;;  %vm276_vm8 = vcmp.eq.s32.totalorder %v274_v30, 1 }
 0x299   : > { %v1455_v45 = vrot.slane %v1451_v24, %v2269_v9  ;;  %v1459_v46 = vrot.slane %v1451_v24, %v2271_v10 }
 0x29b   : > { %1560 = vperm.xlu0 %2071, %v1963_v21   ;;  %1551 = vperm.xlu1 %2072, %v1962_v22   ;;  %vm1460_vm10 = vcmp.eq.s32.totalorder %v1455_v45, 1  ;;  %vm1461_vm13 = vcmp.eq.s32.totalorder %v1459_v46, 1  ;;  %v1938_v21 = vld [vmem:[%s3219_s2 + $0x34] sm:$0xf]  ;;  %v1939_v22 = vld [vmem:[%s3219_s2 + $0x40] sm:$0xf] }
 0x29f   : > { %1571 = vperm.xlu1 %2072, %v1964_v41  }
 0x2a3   : > { %v2638_v47 = vpop.permute.xlu1 %311  ;;  %v2640_v50 = vpop.permute.xlu0 %302 }
 0x2a7   : > { %v1446_v51 = vpop.permute.xlu1 %1445  ;;  %v1444_v39 = vpop.permute.xlu0 %1443 }
 0x2a8   : > { %v1447_v38 = vsel %vm1039_vm9, %v1444_v39, %v1446_v51  ;;  %v1448_v52 = vsel %vm1039_vm9, %v1446_v51, %v1444_v39 }
 0x2a9   : > { %v1462_v53 = vsel %vm1460_vm10, %v1447_v38, %v1448_v52  ;;  %v1463_v56 = vsel %vm1461_vm13, %v1448_v52, %v1447_v38  ;;  %vm296_vm10 = vcmp.eq.s32.totalorder %v294_v34, 1  ;;  %v1951_v38 = vld [vmem:[%s3219_s2 + $0x4c] sm:$0xf]  ;;  %v1952_v52 = vld [vmem:[%s3219_s2 + $0x58] sm:$0xf] }
 0x2aa   : > { %v1466_v57 = vrot.slane %v1462_v53, 4  ;;  %v1467_v58 = vrot.slane %v1463_v56, 4  ;;  %v314_v53 = vmul.f32 %v2638_v47, %v2531_v55 }
 0x2ab   : > { %v2647_v59 = vpop.permute.xlu1 %322  ;;  %v2649_v60 = vpop.permute.xlu0 %364 }
 0x2ac   : > { %v2652_v61 = vmax.f32 %v2509_v49, %v1467_v58  ;;  %v2655_v62 = vmax.f32 %v2506_v48, %v1466_v57  ;;  %v1968_v48 = vld [vmem:[%s3219_s2 + $0x74] sm:$0xf]  ;;  %v1969_v49 = vld [vmem:[%s3219_s2 + $0x80] sm:$0xf] }
 0x2ae   : > { %v1475_v63 = vrot.slane %v2652_v61, 4  ;;  %v1474_v1 = vrot.slane %v2655_v62, 4 }
 0x2af   : > { %v2659_v2 = vpop.permute.xlu1 %373  ;;  %v2661_v6 = vpop.permute.xlu0 %384 }
 0x2b0   : > { %1480 = vrot.lane.b32.xlu0 %v1475_v63, %s2157_s20  ;;  %1478 = vrot.lane.b32.xlu1 %v1474_v1, %s2157_s20 }
 0x2b3   : > { %v260_v17 = vpop.permute.xlu0 %259  ;;  %v258_v18 = vpop.permute.xlu1 %257 }
 0x2b4   : > { %1486 = vrot.lane.b32.xlu0 %v1475_v63, %s2158_s9  ;;  %1484 = vrot.lane.b32.xlu1 %v1474_v1, %s2158_s9  ;;  %v265_v31 = vsel %vm263_vm1, %v260_v17, %v258_v18  ;;  %v264_v40 = vsel %vm263_vm1, %v258_v18, %v260_v17  ;;  %vm638_vm1 = vcmp.ge.s32.totalorder %v2266_v5, 2  ;;  %v1953_v18 = vld [vmem:[%s3219_s2 + $0x64] sm:$0xf] }
 0x2b5   : > { %v2715_v37 = vsel %vm275_vm4, %v265_v31, 0.0  ;;  %v2735_v39 = vsel %vm276_vm8, %v264_v40, 0.0 }
 0x2b6   : > { %v305_v46 = vmul.f32 %v2640_v50, %v2715_v37  ;;  %v306_v1 = vmul.f32 %v2640_v50, %v2735_v39 }
 0x2b7   : > { %v282_v7 = vpop.permute.xlu0 %281  ;;  %v280_v11 = vpop.permute.xlu1 %279 }
 0x2b8   : > { %1613 = vperm.xlu0 %2071, %v1968_v48   ;;  %1622 = vperm.xlu1 %2072, %v1969_v49   ;;  %v284_v36 = vsel %vm283_vm2, %v280_v11, %v282_v7  ;;  %v285_v51 = vsel %vm283_vm2, %v282_v7, %v280_v11  ;;  %v316_v17 = vadd.f32 %v314_v53, %v305_v46  ;;  %vm639_vm2 = vcmp.lt.s32.totalorder %v2266_v5, 14 }
 0x2b9   : > { %v2725_v41 = vsel %vm295_vm5, %v284_v36, 0.0  ;;  %v2747_v57 = vsel %vm296_vm10, %v285_v51, 0.0  ;;  %v315_v48 = vmul.f32 %v2638_v47, %v2528_v54  ;;  %v368_v47 = vmul.f32 %v2649_v60, %v2735_v39 }
 0x2ba   : > { %v325_v56 = vmul.f32 %v2647_v59, %v2725_v41  ;;  %v326_v49 = vmul.f32 %v2647_v59, %v2747_v57  ;;  %v1943_v59 = vld [vmem:[%s3220_s3 + $0x4] sm:$0xf]  ;;  %v673_v16 = vsel %vm639_vm2, 1, %v2147_v0 }
 0x2bb   : > { %v2682_v42 = vpop.permute.xlu0 %699  ;;  %v2684_v15 = vpop.permute.xlu1 %690  ;;  %v317_v14 = vadd.f32 %v315_v48, %v306_v1  ;;  %v677_v34 = vrot.slane %v673_v16, %v2269_v9  ;;  %v1957_v1 = vld [vmem:[%s3220_s3 + $0x8] sm:$0xf] }
 0x2bc   : > { %1633 = vperm.xlu0 %2071, %v1970_v13   ;;  %333 = vperm.xlu1 %2072, %v1924_v8   ;;  %v327_v7 = vadd.f32 %v325_v56, %v316_v17  ;;  %v653_v13 = vsel %vm638_vm1, 1, %v2147_v0  ;;  %v367_v8 = vmul.f32 %v2649_v60, %v2715_v37  ;;  %v388_v60 = vmul.f32 %v2661_v6, %v2747_v57 }
 0x2bd   : > { %v657_v43 = vrot.slane %v653_v13, %v2269_v9  ;;  %v328_v3 = vadd.f32 %v326_v49, %v317_v14  ;;  %v661_v30 = vrot.slane %v653_v13, %v2271_v10  ;;  %vm682_vm15 = vcmp.eq.s32.totalorder %v677_v34, 1  ;;  %v1966_v13 = vld [vmem:[%s3219_s2 + $0x7c] sm:$0xf] }
 0x2bf   : > { %v2694_v25 = vpop.permute.xlu0 %752  ;;  %v2696_v27 = vpop.permute.xlu1 %710  ;;  %vm662_vm13 = vcmp.eq.s32.totalorder %v657_v43, 1  ;;  %vm663_vm14 = vcmp.eq.s32.totalorder %v661_v30, 1 }
 0x2c0   : > { %342 = vperm.xlu0 %2071, %v1925_v19   ;;  %353 = vperm.xlu1 %2072, %v1926_v20   ;;  %v376_v19 = vmul.f32 %v2659_v2, %v2531_v55  ;;  %v387_v20 = vmul.f32 %v2661_v6, %v2725_v41 }
 0x2c2   : > { %v378_v36 = vadd.f32 %v376_v19, %v367_v8  ;;  %v702_v8 = vmul.f32 %v2682_v42, %v2588_v26 }
 0x2c3   : > { %v2708_v32 = vpop.permute.xlu0 %1072  ;;  %v2710_v33 = vpop.permute.xlu1 %761 }
 0x2c4   : > { %396 = vperm.xlu0 %2071, %v393_v4   ;;  %721 = vperm.xlu1 %2072, %v1937_v29   ;;  %v377_v4 = vmul.f32 %v2659_v2, %v2528_v54  ;;  %v389_v40 = vadd.f32 %v387_v20, %v378_v36 }
 0x2c7   : > { %v2727_v24 = vpop.permute.xlu0 %772  ;;  %v2729_v45 = vpop.permute.xlu1 %1081 }
 0x2c8   : > { %730 = vperm.xlu0 %2071, %v1938_v21   ;;  %741 = vperm.xlu1 %2072, %v1939_v22   ;;  %v681_v21 = vrot.slane %v673_v16, %v2271_v10  ;;  %v379_v22 = vadd.f32 %v377_v4, %v368_v47  ;;  %v1967_v47 = vld [vmem:[%s3219_s2 + $0x88] sm:$0xf] }
 0x2ca   : > { %vm683_vm4 = vcmp.eq.s32.totalorder %v681_v21, 1  ;;  %v2159_v21 = vmov 0.0  }
 0x2cb   : > { %v2749_v58 = vpop.permute.xlu0 %1134  ;;  %v2751_v63 = vpop.permute.xlu1 %1092  ;;  %537 = vmatprep.mubr.f32.mxu1 %v2159_v21  ;;  %1298 = vmatprep.mubr.f32.mxu0 %v2159_v21 }
 0x2cc   : > { %1103 = vperm.xlu0 %2071, %v1951_v38   ;;  %1112 = vperm.xlu1 %2072, %v1952_v52   ;;  %v390_v38 = vadd.f32 %v388_v60, %v379_v22 }
 0x2cf   : > { %v647_v11 = vpop.permute.xlu0 %646  ;;  %v2764_v50 = vpop.permute.xlu1 %1143 }
 0x2d0   : > { %1123 = vperm.xlu0 %2071, %v1953_v18   ;;  %401 = vrot.lane.b32.xlu1 %v327_v7, %s2151_s19  ;;  %v1965_v18 = vld [vmem:[%s3219_s2 + $0x70] sm:$0xf] }
 0x2d3   : > { %v2785_v29 = vpop.permute.xlu0 %1154  ;;  %v649_v31 = vpop.permute.xlu1 %648 }
 0x2d4   : > { %403 = vrot.lane.b32.xlu0 %v328_v3, %s2151_s19  ;;  %785 = vperm.xlu1 %2072, %v1943_v59   ;;  %v652_v2 = vsel %vm650_vm12, %v649_v31, %v647_v11  ;;  %v651_v6 = vsel %vm650_vm12, %v647_v11, %v649_v31  ;;  %s3248_s19 = smov 127   ;;  %v703_v59 = vmul.f32 %v2682_v42, %v2595_v28  ;;  %vm1034_vm12 = vcmp.lt.s32.totalorder %v2266_v5, 12 }
 0x2d5   : > { %v2796_v52 = vsel %vm662_vm13, %v652_v2, 0.0  ;;  %v2806_v17 = vsel %vm663_vm14, %v651_v6, 0.0  ;;  %v764_v3 = vmul.f32 %v2710_v33, %v2588_v26  ;;  %vm1198_vm14 = vcmp.lt.s32.totalorder %v2274_v12, 124 }
 0x2d6   : > { %v693_v49 = vmul.f32 %v2684_v15, %v2796_v52  ;;  %v694_v11 = vmul.f32 %v2684_v15, %v2806_v17  ;;  %v755_v19 = vmul.f32 %v2694_v25, %v2796_v52  ;;  %v756_v43 = vmul.f32 %v2694_v25, %v2806_v17 }
 0x2d7   : > { %v669_v46 = vpop.permute.xlu0 %668  ;;  %v667_v51 = vpop.permute.xlu1 %666 }
 0x2d8   : > { %423 = vrot.lane.b32.xlu0 %v389_v40, %s3248_s19  ;;  %v671_v53 = vsel %vm670_vm11, %v667_v51, %v669_v46  ;;  %v672_v56 = vsel %vm670_vm11, %v669_v46, %v667_v51  ;;  %425 = vrot.lane.b32.xlu1 %v390_v38, %s3248_s19  ;;  %v704_v16 = vadd.f32 %v702_v8, %v693_v49  ;;  %vm1033_vm11 = vcmp.ge.s32.totalorder %v2266_v5, 4 }
 0x2d9   : > { %v2811_v48 = vsel %vm682_vm15, %v671_v53, 0.0  ;;  %v2815_v7 = vsel %vm683_vm4, %v672_v56, 0.0  ;;  %v705_v20 = vadd.f32 %v703_v59, %v694_v11  ;;  %v766_v31 = vadd.f32 %v764_v3, %v755_v19 }
 0x2da   : > { %v713_v14 = vmul.f32 %v2696_v27, %v2811_v48  ;;  %v714_v15 = vmul.f32 %v2696_v27, %v2815_v7  ;;  %v775_v42 = vmul.f32 %v2727_v24, %v2811_v48  ;;  %v765_v27 = vmul.f32 %v2710_v33, %v2595_v28 }
 0x2db   : > { %v776_v30 = vmul.f32 %v2727_v24, %v2815_v7  ;;  %v1042_v33 = vsel %vm1033_vm11, 1, %v2147_v0  ;;  %v1055_v24 = vsel %vm1034_vm12, 1, %v2147_v0  ;;  %v1084_v49 = vmul.f32 %v2729_v45, %v2616_v44 }
 0x2dc   : > { %1167 = vperm.xlu0 %2071, %v1957_v1   ;;  %1582 = vperm.xlu1 %2072, %v1965_v18   ;;  %v715_v4 = vadd.f32 %v713_v14, %v704_v16  ;;  %v716_v60 = vadd.f32 %v714_v15, %v705_v20  ;;  %v767_v34 = vadd.f32 %v765_v27, %v756_v43  ;;  %vm1176_vm15 = vcmp.lt.s32.totalorder %v2274_v12, 4 }
 0x2dd   : > { %v777_v25 = vadd.f32 %v775_v42, %v766_v31  ;;  %v1046_v22 = vrot.slane %v1042_v33, %v2269_v9  ;;  %v1050_v2 = vrot.slane %v1042_v33, %v2271_v10  ;;  %v1059_v40 = vrot.slane %v1055_v24, %v2269_v9 }
 0x2de   : > { %v778_v36 = vadd.f32 %v776_v30, %v767_v34  ;;  %v1063_v6 = vrot.slane %v1055_v24, %v2271_v10  ;;  %v1085_v11 = vmul.f32 %v2729_v45, %v2619_v23  ;;  %v1146_v14 = vmul.f32 %v2764_v50, %v2616_v44 }
 0x2df   : > { %vm1051_vm5 = vcmp.eq.s32.totalorder %v1046_v22, 1  ;;  %vm1052_vm8 = vcmp.eq.s32.totalorder %v1050_v2, 1  ;;  %vm1064_vm10 = vcmp.eq.s32.totalorder %v1059_v40, 1  ;;  %v1147_v3 = vmul.f32 %v2764_v50, %v2619_v23  ;;  %v2904_v50 = vld [vmem:[%s3221_s4] sm:$0xff] }
 0x2e0   : > { %1591 = vperm.xlu0 %2071, %v1966_v13   ;;  %1602 = vperm.xlu1 %2072, %v1967_v47   ;;  %vm1065_vm1 = vcmp.eq.s32.totalorder %v1063_v6, 1 }
 0x2e4   : > { %790 = vrot.lane.b32.xlu0 %v715_v4, %s3249_s16  ;;  %792 = vrot.lane.b32.xlu1 %v716_v60, %s3249_s16  ;;  %v1490_v60 = vand.u32 4, %v2313_v35 }
 0x2e8   : > { %812 = vrot.lane.b32.xlu0 %v777_v25, %s3250_s17  ;;  %814 = vrot.lane.b32.xlu1 %v778_v36, %s3250_s17  ;;  %v2081_v36 = vld [vmem:[%s3217_s0 + $0x1] ss:$2 sm:$0x3]  ;;  %s2163_s17 = smov [#allocation2]  }
 0x2e9   : > { %vm1513_vm2 = vcmp.ge.s32.totalorder %v2081_v36, 8  ;;  %vm1514_vm13 = vcmp.lt.s32.totalorder %v2081_v36, 8  ;;  %s2087_s19 = sshll.u32 %s2163_s17, 4  ;;  %s2088_s19 = int_to_ptr.vmem [resolvable:$false] %s2087_s19 }
 0x2ea   : > { %v1521_v40 = vsel %vm1513_vm2, 1, %v2147_v0  ;;  %v1534_v6 = vsel %vm1514_vm13, 1, %v2147_v0  ;;  %s2089_s15 = scalar_lea.vmem %s2088_s19, 1024 }
 0x309   : > { %v1038_v46 = vpop.permute.xlu0 %1037  ;;  %v1036_v51 = vpop.permute.xlu1 %1035 }
 0x30a   : > { %v1040_v5 = vsel %vm1039_vm9, %v1036_v51, %v1038_v46  ;;  %v1041_v38 = vsel %vm1039_vm9, %v1038_v46, %v1036_v51  ;;  %vm1491_vm9 = vcmp.eq.s32.totalorder %v1490_v60, 0 }
 0x30b   : > { %v2863_v53 = vsel %vm1051_vm5, %v1041_v38, 0.0  ;;  %v2865_v56 = vsel %vm1052_vm8, %v1040_v5, 0.0  ;;  %v2867_v1 = vsel %vm1064_vm10, %v1040_v5, 0.0  ;;  %v2869_v18 = vsel %vm1065_vm1, %v1041_v38, 0.0 }
 0x30c   : > { %v1075_v13 = vmul.f32 %v2708_v32, %v2863_v53  ;;  %v1076_v8 = vmul.f32 %v2708_v32, %v2865_v56  ;;  %v1137_v47 = vmul.f32 %v2749_v58, %v2863_v53  ;;  %v1095_v16 = vmul.f32 %v2751_v63, %v2867_v1 }
 0x30d   : > { %v1096_v45 = vmul.f32 %v2751_v63, %v2869_v18  ;;  %v1138_v43 = vmul.f32 %v2749_v58, %v2865_v56  ;;  %v1157_v4 = vmul.f32 %v2785_v29, %v2867_v1  ;;  %v1971_v63 = vld [vmem:[%s3220_s3 + $0xc] sm:$0xf]  ;;  %v1158_v58 = vmul.f32 %v2785_v29, %v2869_v18 }
 0x30e   : > { %v1086_v59 = vadd.f32 %v1084_v49, %v1075_v13  ;;  %v1087_v15 = vadd.f32 %v1085_v11, %v1076_v8  ;;  %v1148_v32 = vadd.f32 %v1146_v14, %v1137_v47  ;;  %v2913_v29 = vld [vmem:[%s3221_s4 + $0x8] sm:$0xff]  ;;  %v1492_v35 = vsel %vm1491_vm9, 1, %v2147_v0 }
 0x30f   : > { %v1149_v42 = vadd.f32 %v1147_v3, %v1138_v43  ;;  %v1496_v33 = vrot.slane %v1492_v35, %v2269_v9  ;;  %v1500_v24 = vrot.slane %v1492_v35, %v2271_v10  ;;  %v1529_v5 = vrot.slane %v1521_v40, %v2271_v10 }
 0x310   : > { %v1097_v19 = vadd.f32 %v1095_v16, %v1086_v59  ;;  %v1098_v20 = vadd.f32 %v1096_v45, %v1087_v15  ;;  %v1159_v27 = vadd.f32 %v1157_v4, %v1148_v32  ;;  %v1542_v47 = vrot.slane %v1534_v6, %v2271_v10 }
 0x311   : > { %v1160_v30 = vadd.f32 %v1158_v58, %v1149_v42  ;;  %vm1501_vm4 = vcmp.eq.s32.totalorder %v1496_v33, 1  ;;  %vm1502_vm11 = vcmp.eq.s32.totalorder %v1500_v24, 1  ;;  %v1525_v59 = vrot.slane %v1521_v40, %v2269_v9 }
 0x312   : > { %1172 = vrot.lane.b32.xlu0 %v1097_v19, %s2158_s9  ;;  %1174 = vrot.lane.b32.xlu1 %v1098_v20, %s2158_s9  ;;  %v1538_v45 = vrot.slane %v1534_v6, %v2269_v9  ;;  %vm1531_vm12 = vcmp.eq.s32.totalorder %v1529_v5, 1  ;;  %vm1544_vm5 = vcmp.eq.s32.totalorder %v1542_v47, 1  ;;  %s242_s9 = sand.u32 1, %s2137_s22  }
 0x313   : > { %vm1530_vm8 = vcmp.eq.s32.totalorder %v1525_v59, 1  ;;  %s1918_s26 = sshll.u32 %s242_s9, 5 }
 0x314   : > { %vm1543_vm10 = vcmp.eq.s32.totalorder %v1538_v45, 1  ;;  %s244_s12 = scalar_lea.vmem [#allocation2], %s1918_s26 }
 0x315   : > { %s1852_s28 = sshll.u32 %s244_s12, 4  ;;  %s3171_s28 = int_to_ptr.vmem [resolvable:$true] %s1852_s28 }
 0x316   : > { %1646 = vperm.xlu0 %2071, %v1971_v63   ;;  %1194 = vrot.lane.b32.xlu1 %v1159_v27, %s2157_s20  ;;  %p2090_p0 = scmp.lt.s32.totalorder %s3171_s28, %s2088_s19 }
 0x31a   : > { %v1552_v31 = vpop.permute.xlu1 %1551  ;;  %1196 = vrot.lane.b32.xlu0 %v1160_v30, %s2157_s20  ;;  %838 = vrot.lane.b32.xlu1 %v2904_v50, %s2157_s20  ;;  %v1561_v34 = vpop.permute.xlu0 %1560 }
 0x31e   : > { %v1572_v25 = vpop.permute.xlu1 %1571  ;;  %840 = vrot.lane.b32.xlu1 %v2913_v29, %s2157_s20  ;;  %1220 = vrot.lane.b32.xlu0 %v2904_v50, %s2160_s11  ;;  %s2161_s20 = smov 8  }
 0x322   : > { %v1481_v22 = vpop.permute.xlu0 %1480  ;;  %v1479_v2 = vpop.permute.xlu1 %1478 }
 0x323   : > { %v1482_v38 = vsel %vm1198_vm14, %v1479_v2, %v1481_v22  ;;  %v1483_v49 = vsel %vm1198_vm14, %v1481_v22, %v1479_v2 }
 0x326   : > { %v1487_v46 = vpop.permute.xlu0 %1486  ;;  %v1485_v51 = vpop.permute.xlu1 %1484 }
 0x327   : > { %v1488_v11 = vsel %vm1176_vm15, %v1485_v51, %v1487_v46  ;;  %v1489_v13 = vsel %vm1176_vm15, %v1487_v46, %v1485_v51 }
 0x328   : > { %v1503_v8 = vsel %vm1501_vm4, %v1482_v38, %v1489_v13  ;;  %v1504_v14 = vsel %vm1502_vm11, %v1483_v49, %v1488_v11 }
 0x329   : > { %v1507_v15 = vrot.slane %v1503_v8, 4  ;;  %v1508_v16 = vrot.slane %v1504_v14, 4 }
 0x32b   : > { %v1511_v19 = vmax.f32 %v2655_v62, %v1507_v15  ;;  %v1512_v20 = vmax.f32 %v2652_v61, %v1508_v16  ;;  %v447_v15 = vld [vmem:[%s3222_s5] sm:$0xff] }
 0x32d   : > { %v2943_v43 = vrot.slane %v1511_v19, 4  ;;  %v2945_v32 = vrot.slane %v1512_v20, 4  ;;  %v2988_v19 = vld [vmem:[%s3217_s0] ss:$2 sm:$0x3]  ;;  %v448_v20 = vld [vmem:[%s3222_s5 + $0x8] sm:$0xff] }
 0x32e   : > { %vm391_vm1 = vcmp.ge.s32.totalorder %v2988_v19, 1  ;;  %vm392_vm9 = vcmp.lt.s32.totalorder %v2988_v19, 15 }
 0x32f   : > { %v2948_v3 = vsel %vm1531_vm12, %v2943_v43, 0.0  ;;  %v2951_v4 = vsel %vm1544_vm5, %v2943_v43, 0.0  ;;  %v1564_v63 = vmul.f32 %v1561_v34, %v2945_v32  ;;  %v2955_v62 = vsel %vm1530_vm8, %v2945_v32, 0.0 }
 0x330   : > { %v1555_v61 = vmul.f32 %v1552_v31, %v2948_v3  ;;  %v2959_v42 = vsel %vm1543_vm10, %v2945_v32, 0.0  ;;  %v1554_v27 = vmul.f32 %v1552_v31, %v2955_v62  ;;  %v1563_v58 = vmul.f32 %v1561_v34, %v2943_v43 }
 0x331   : > { %v1575_v30 = vmul.f32 %v1572_v25, %v2951_v4  ;;  %v1574_v36 = vmul.f32 %v1572_v25, %v2959_v42  ;;  %vm779_vm12 = vcmp.ge.s32.totalorder %v2988_v19, 2  ;;  %vm459_vm5 = vcmask 31744  }
 0x332   : > { %v1566_v60 = vadd.f32 %v1564_v63, %v1555_v61  ;;  %v1565_v35 = vadd.f32 %v1563_v58, %v1554_v27  ;;  %v408_v27 = vsel %vm391_vm1, 1, %v2147_v0  ;;  %vm780_vm8 = vcmp.lt.s32.totalorder %v2988_v19, 14 }
 0x334   : > { %v1577_v33 = vadd.f32 %v1575_v30, %v1566_v60  ;;  %v1576_v24 = vadd.f32 %v1574_v36, %v1565_v35 }
 0x336   : > { %1653 = vrot.lane.b32.xlu0 %v1577_v33, %s2161_s20  ;;  %1651 = vrot.lane.b32.xlu1 %v1576_v24, %s2161_s20 }
 0x337   : > { %v1614_v22 = vpop.permute.xlu0 %1613  ;;  %v1623_v2 = vpop.permute.xlu1 %1622 }
 0x338   : > { %v1616_v40 = vmul.f32 %v1614_v22, %v2955_v62  ;;  %v1617_v6 = vmul.f32 %v1614_v22, %v2948_v3  ;;  %v1625_v31 = vmul.f32 %v1623_v2, %v2943_v43  ;;  %v1626_v34 = vmul.f32 %v1623_v2, %v2945_v32 }
 0x339   : > { %v416_v22 = vrot.slane %v408_v27, %v2271_v10  ;;  %v430_v2 = vsel %vm392_vm9, 1, %v2147_v0 }
 0x33a   : > { %v1627_v5 = vadd.f32 %v1625_v31, %v1616_v40  ;;  %v1628_v38 = vadd.f32 %v1626_v34, %v1617_v6 }
 0x33b   : > { %v1634_v46 = vpop.permute.xlu0 %1633  ;;  %v334_v51 = vpop.permute.xlu1 %333  ;;  %vm3016_vm13 = vcmp.eq.s32.totalorder %v416_v22, 1 }
 0x33c   : > { %v1636_v25 = vmul.f32 %v1634_v46, %v2959_v42  ;;  %v1637_v49 = vmul.f32 %v1634_v46, %v2951_v4  ;;  %v336_v58 = vmul.f32 %v334_v51, %v2715_v37  ;;  %v337_v60 = vmul.f32 %v334_v51, %v2735_v39 }
 0x33e   : > { %v1638_v11 = vadd.f32 %v1636_v25, %v1627_v5  ;;  %v1639_v13 = vadd.f32 %v1637_v49, %v1628_v38  ;;  %v434_v5 = vrot.slane %v430_v2, %v2269_v9  ;;  %v438_v38 = vrot.slane %v430_v2, %v2271_v10 }
 0x33f   : > { %v343_v8 = vpop.permute.xlu0 %342  ;;  %v354_v14 = vpop.permute.xlu1 %353 }
 0x340   : > { %1673 = vrot.lane.b32.xlu0 %v1638_v11, %s2160_s11  ;;  %1675 = vrot.lane.b32.xlu1 %v1639_v13, %s2160_s11  ;;  %v345_v63 = vmul.f32 %v343_v8, %v2531_v55  ;;  %v346_v61 = vmul.f32 %v343_v8, %v2528_v54  ;;  %v412_v54 = vrot.slane %v408_v27, %v2269_v9  ;;  %vm439_vm4 = vcmp.eq.s32.totalorder %v434_v5, 1 }
 0x341   : > { %vm440_vm11 = vcmp.eq.s32.totalorder %v438_v38, 1 }
 0x342   : > { %v347_v37 = vadd.f32 %v345_v63, %v336_v58  ;;  %v348_v40 = vadd.f32 %v346_v61, %v337_v60  ;;  %vm3012_vm2 = vcmp.eq.s32.totalorder %v412_v54, 1 }
 0x343   : > { %v397_v47 = vpop.permute.xlu0 %396  ;;  %v2973_v59 = vpop.permute.xlu1 %721 }
 0x344   : > { %1222 = vrot.lane.b32.xlu0 %v2913_v29, %s2160_s11  ;;  %1699 = vrot.lane.b32.xlu1 %v2904_v50, %s2162_s29  ;;  %s1982_s11 = sshll.u32 %s2221_s25, 9  ;;  %s3175_s25 = scalar_lea.sflag [#allocation3], %s242_s9 }
 0x345   : > { %s3169_s16 = scalar_lea.hbm %s3223_s6, %s1982_s11 }
 0x347   : > { %v2981_v16 = vpop.permute.xlu0 %730  ;;  %v2983_v45 = vpop.permute.xlu1 %741 }
 0x348   : > { %1701 = vrot.lane.b32.xlu0 %v2913_v29, %s2162_s29  ;;  %451 = vperm.xlu1 %2072, %v447_v15   ;;  %v733_v22 = vmul.f32 %v2981_v16, %v2588_v26  ;;  %v734_v2 = vmul.f32 %v2981_v16, %v2595_v28  ;;  %v725_v26 = vmul.f32 %v2973_v59, %v2806_v17 }
 0x34b   : > { %v1104_v30 = vpop.permute.xlu0 %1103  ;;  %v1113_v35 = vpop.permute.xlu1 %1112 }
 0x34c   : > { %v1106_v36 = vmul.f32 %v1104_v30, %v2863_v53  ;;  %v1107_v33 = vmul.f32 %v1104_v30, %v2865_v56  ;;  %v1115_v24 = vmul.f32 %v1113_v35, %v2616_v44  ;;  %v1116_v55 = vmul.f32 %v1113_v35, %v2619_v23  ;;  %456 = vperm.xlu0 %2071, %v448_v20  }
 0x34d   : > { %v356_v53 = vmul.f32 %v354_v14, %v2725_v41  ;;  %v357_v56 = vmul.f32 %v354_v14, %v2747_v57 }
 0x34e   : > { %v1117_v39 = vadd.f32 %v1115_v24, %v1106_v36  ;;  %v1118_v6 = vadd.f32 %v1116_v55, %v1107_v33  ;;  %v797_v55 = vsel %vm779_vm12, 1, %v2147_v0  ;;  %vm1655_vm12 = vcmp.lt.s32.totalorder %v2274_v12, 8 }
 0x34f   : > { %v1124_v31 = vpop.permute.xlu0 %1123  ;;  %v402_v34 = vpop.permute.xlu1 %401  ;;  %v358_v25 = vadd.f32 %v356_v53, %v347_v37  ;;  %v359_v41 = vadd.f32 %v357_v56, %v348_v40 }
 0x350   : > { %v1126_v44 = vmul.f32 %v1124_v31, %v2867_v1  ;;  %v1127_v23 = vmul.f32 %v1124_v31, %v2869_v18  ;;  %v724_v31 = vmul.f32 %v2973_v59, %v2796_v52 }
 0x351   : > { %v399_v15 = vadd.f32 %v397_v47, %v358_v25  ;;  %v400_v20 = vadd.f32 %v397_v47, %v359_v41 }
 0x352   : > { %v3022_v49 = vadd.f32 %v1126_v44, %v1117_v39  ;;  %v3024_v57 = vadd.f32 %v1127_v23, %v1118_v6  ;;  %v801_v39 = vrot.slane %v797_v55, %v2269_v9  ;;  %v805_v6 = vrot.slane %v797_v55, %v2271_v10 }
 0x353   : > { %v404_v1 = vpop.permute.xlu0 %403  ;;  %v3026_v18 = vpop.permute.xlu1 %785  ;;  %v735_v53 = vadd.f32 %v733_v22, %v724_v31 }
 0x354   : > { %v406_v11 = vsel %vm405_vm7, %v402_v34, %v404_v1  ;;  %v407_v13 = vsel %vm405_vm7, %v404_v1, %v402_v34  ;;  %vm466_vm7 = vcmask 1043456   ;;  %v819_v34 = vsel %vm780_vm8, 1, %v2147_v0 }
 0x355   : > { %v419_v8 = vsel %vm3012_vm2, %v407_v13, 0.0  ;;  %v420_v14 = vsel %vm3016_vm13, %v406_v11, 0.0  ;;  %vm3073_vm10 = vcmp.eq.s32.totalorder %v805_v6, 1  ;;  %v823_v23 = vrot.slane %v819_v34, %v2269_v9 }
 0x356   : > { %v421_v27 = vadd.f32 %v419_v8, %v399_v15  ;;  %v422_v30 = vadd.f32 %v420_v14, %v400_v20  ;;  %v827_v46 = vrot.slane %v819_v34, %v2271_v10 }
 0x357   : > { %v424_v63 = vpop.permute.xlu0 %423  ;;  %v426_v61 = vpop.permute.xlu1 %425  ;;  %vm828_vm1 = vcmp.eq.s32.totalorder %v823_v23, 1 }
 0x358   : > { %v428_v58 = vsel %vm427_vm6, %v424_v63, %v426_v61  ;;  %v429_v60 = vsel %vm427_vm6, %v426_v61, %v424_v63  ;;  %vm3069_vm6 = vcmp.eq.s32.totalorder %v801_v39, 1  ;;  %vm829_vm9 = vcmp.eq.s32.totalorder %v827_v46, 1 }
 0x359   : > { %v441_v35 = vsel %vm439_vm4, %v428_v58, 0.0  ;;  %v442_v36 = vsel %vm440_vm11, %v429_v60, 0.0 }
 0x35a   : > { %v443_v33 = vadd.f32 %v441_v35, %v421_v27  ;;  %v444_v24 = vadd.f32 %v442_v36, %v422_v30 }
 0x35b   : > { %v3041_v47 = vpop.permute.xlu0 %1167  ;;  %v1583_v54 = vpop.permute.xlu1 %1582 }
 0x35c   : > { %1930 = vmatprep.subr.msk.mxu1 %vm466_vm7, %v444_v24  ;;  %v1585_v37 = vmul.f32 %v1583_v54, %v2955_v62  ;;  %v1586_v40 = vmul.f32 %v1583_v54, %v2948_v3 }
 0x35d   : > { %1931 = vmatpush1.msk.msra.mxu1 %vm466_vm7, %v443_v33 }
 0x35e   : > { %1932 = vmatmul.mubr.msk.f32.vlgmr.msra.gmra.mrb[0].mxu1 %vm459_vm5, %v2904_v50  ;;  %v736_v50 = vadd.f32 %v734_v2, %v725_v26 }
 0x35f   : > { %v1592_v28 = vpop.permute.xlu0 %1591  ;;  %543 = vmatprep.mubr.f32.mxu1 %v2159_v21  ;;  %v1603_v16 = vpop.permute.xlu1 %1602 }
 0x360   : > { %v1594_v3 = vmul.f32 %v1592_v28, %v2943_v43  ;;  %v1595_v62 = vmul.f32 %v1592_v28, %v2945_v32  ;;  %v1605_v56 = vmul.f32 %v1603_v16, %v2959_v42  ;;  %v1606_v52 = vmul.f32 %v1603_v16, %v2951_v4 }
 0x361   : > { %v744_v32 = vmul.f32 %v2983_v45, %v2811_v48  ;;  %v745_v42 = vmul.f32 %v2983_v45, %v2815_v7 }
 0x362   : > { %v1596_v44 = vadd.f32 %v1594_v3, %v1585_v37  ;;  %v1597_v17 = vadd.f32 %v1595_v62, %v1586_v40  ;;  %1933 = vmatmul.mubr.msk.f32.gmra.mrb[2].mxu1 %vm459_vm5, %v2913_v29  ;;  %v1170_v3 = vadd.f32 %v3041_v47, %v3022_v49  ;;  %v1171_v62 = vadd.f32 %v3041_v47, %v3024_v57 }
 0x363   : > { %v791_v4 = vpop.permute.xlu0 %790  ;;  %916 = vmatprep.mubr.f32.mxu1 %v2159_v21  ;;  %v793_v51 = vpop.permute.xlu1 %792  ;;  %v746_v25 = vadd.f32 %v744_v32, %v735_v53  ;;  %v747_v29 = vadd.f32 %v745_v42, %v736_v50 }
 0x364   : > { %v3086_v5 = vadd.f32 %v1605_v56, %v1596_v44  ;;  %v3088_v38 = vadd.f32 %v1606_v52, %v1597_v17  ;;  %v795_v48 = vsel %vm794_vm0, %v791_v4, %v793_v51  ;;  %v796_v7 = vsel %vm794_vm0, %v793_v51, %v791_v4 }
 0x365   : > { %v808_v45 = vsel %vm3069_vm6, %v796_v7, 0.0  ;;  %v809_v41 = vsel %vm3073_vm10, %v795_v48, 0.0  ;;  %v788_v1 = vadd.f32 %v3026_v18, %v746_v25  ;;  %v789_v11 = vadd.f32 %v3026_v18, %v747_v29 }
 0x366   : > { %vm1161_vm0 = vcmp.ge.s32.totalorder %v2988_v19, 4  ;;  %vm1677_vm10 = vcmp.lt.s32.totalorder %v2274_v12, 120 }
 0x367   : > { %v813_v13 = vpop.permute.xlu0 %812  ;;  %v815_v8 = vpop.permute.xlu1 %814  ;;  %v810_v14 = vadd.f32 %v808_v45, %v788_v1  ;;  %v811_v15 = vadd.f32 %v809_v41, %v789_v11  ;;  %v1179_v35 = vsel %vm1161_vm0, 1, %v2147_v0 }
 0x368   : > { %v817_v20 = vsel %vm816_vm3, %v813_v13, %v815_v8  ;;  %v818_v63 = vsel %vm816_vm3, %v815_v8, %v813_v13  ;;  %vm1162_vm3 = vcmp.lt.s32.totalorder %v2988_v19, 12  ;;  %v1183_v33 = vrot.slane %v1179_v35, %v2269_v9 }
 0x369   : > { %v830_v61 = vsel %vm828_vm1, %v817_v20, 0.0  ;;  %v831_v27 = vsel %vm829_vm9, %v818_v63, 0.0  ;;  %v1187_v24 = vrot.slane %v1179_v35, %v2271_v10  ;;  %v1201_v22 = vsel %vm1162_vm3, 1, %v2147_v0 }
 0x36a   : > { %v832_v58 = vadd.f32 %v830_v61, %v810_v14  ;;  %v833_v60 = vadd.f32 %v831_v27, %v811_v15  ;;  %vm1188_vm2 = vcmp.eq.s32.totalorder %v1183_v33, 1  ;;  %v1205_v39 = vrot.slane %v1201_v22, %v2269_v9 }
 0x36b   : > { %vm3115_vm13 = vcmp.eq.s32.totalorder %v1187_v24, 1  ;;  %v1209_v6 = vrot.slane %v1201_v22, %v2271_v10 }
 0x36c   : > { %1944 = vmatprep.subr.msk.mxu1 %vm466_vm7, %v833_v60  ;;  %vm1210_vm4 = vcmp.eq.s32.totalorder %v1205_v39, 1 }
 0x36d   : > { %1945 = vmatpush1.msk.msra.mxu1 %vm466_vm7, %v832_v58  ;;  %vm1211_vm11 = vcmp.eq.s32.totalorder %v1209_v6, 1 }
 0x384   : > { %v1175_v18 = vpop.permute.xlu1 %1174  ;;  %v1173_v54 = vpop.permute.xlu0 %1172 }
 0x385   : > { %v1177_v37 = vsel %vm1176_vm15, %v1173_v54, %v1175_v18  ;;  %v1178_v40 = vsel %vm1176_vm15, %v1175_v18, %v1173_v54  ;;  %vm1640_vm15 = vcmp.ge.s32.totalorder %v2988_v19, 8 }
 0x386   : > { %v1190_v26 = vsel %vm1188_vm2, %v1178_v40, 0.0  ;;  %v1191_v28 = vsel %vm3115_vm13, %v1177_v37, 0.0  ;;  %v1658_v57 = vsel %vm1640_vm15, 1, %v2147_v0 }
 0x387   : > { %v1192_v34 = vadd.f32 %v1190_v26, %v1170_v3  ;;  %v1193_v56 = vadd.f32 %v1191_v28, %v1171_v62  ;;  %v1662_v47 = vrot.slane %v1658_v57, %v2269_v9  ;;  %v1666_v43 = vrot.slane %v1658_v57, %v2271_v10  ;;  %v1826_v62 = vld [vmem:[%s2255_s13] sm:$0xff] }
 0x388   : > { %v1195_v30 = vpop.permute.xlu1 %1194 }
 0x389   : > { %vm1667_vm8 = vcmp.eq.s32.totalorder %v1662_v47, 1  ;;  %vm1668_vm6 = vcmp.eq.s32.totalorder %v1666_v43, 1  ;;  %v1828_v47 = vld [vmem:[%s2255_s13 + $0x10] sm:$0xff] }
 0x38c   : > { %v839_v36 = vpop.permute.xlu1 %838 }
 0x38d   : > { %1946 = vmatmul.mubr.msk.f32.vlgmr.msra.gmra.mrb[0].mxu1 %vm459_vm5, %v839_v36 }
 0x38e   : > { %922 = vmatprep.mubr.f32.mxu1 %v2159_v21 }
 0x390   : > { %v841_v55 = vpop.permute.xlu1 %840 }
 0x391   : > { %1947 = vmatmul.mubr.msk.f32.gmra.mrb[2].mxu1 %vm459_vm5, %v841_v55 }
 0x395   : > { %v1647_v31 = vpop.permute.xlu0 %1646 }
 0x396   : > { %v1649_v48 = vadd.f32 %v1647_v31, %v3086_v5  ;;  %v1650_v7 = vadd.f32 %v1647_v31, %v3088_v38 }
 0x399   : > { %v1197_v16 = vpop.permute.xlu0 %1196 }
 0x39a   : > { %v1199_v53 = vsel %vm1198_vm14, %v1195_v30, %v1197_v16  ;;  %v1200_v50 = vsel %vm1198_vm14, %v1197_v16, %v1195_v30  ;;  %vm1641_vm14 = vcmp.lt.s32.totalorder %v2988_v19, 8 }
 0x39b   : > { %v1212_v52 = vsel %vm1210_vm4, %v1199_v53, 0.0  ;;  %v1213_v44 = vsel %vm1211_vm11, %v1200_v50, 0.0  ;;  %v1680_v4 = vsel %vm1641_vm14, 1, %v2147_v0  ;;  %v1827_v50 = vld [vmem:[%s2255_s13 + $0x8] sm:$0xff] }
 0x39c   : > { %v1214_v17 = vadd.f32 %v1212_v52, %v1192_v34  ;;  %v1215_v59 = vadd.f32 %v1213_v44, %v1193_v56  ;;  %v1684_v51 = vrot.slane %v1680_v4, %v2269_v9  ;;  %v1688_v25 = vrot.slane %v1680_v4, %v2271_v10  ;;  %v1829_v4 = vld [vmem:[%s2255_s13 + $0x18] sm:$0xff]  ;;  %s2083_s13 = scalar_lea.vmem %s3171_s28, 512 }
 0x39d   : > { %v1221_v49 = vpop.permute.xlu0 %1220  ;;  %p2084_p11 = scmp.ne.s32.totalorder %s3171_s28, %s2083_s13  ;;  %p2091_p1 = scmp.lt.s32.totalorder %s2089_s15, %s2083_s13 }
 0x39e   : > { %1958 = vmatprep.subr.msk.mxu0 %vm466_vm7, %v1215_v59  ;;  %vm1689_vm1 = vcmp.eq.s32.totalorder %v1684_v51, 1  ;;  %vm1690_vm9 = vcmp.eq.s32.totalorder %v1688_v25, 1 }
 0x39f   : > { %1959 = vmatpush1.msk.msra.mxu0 %vm466_vm7, %v1214_v17  ;;  %p2085_p12 = pnand %p2084_p11, %p2238_p5  ;;  %p2092_p2 = por %p2091_p1, %p2090_p0 }
 0x3a0   : > { %1960 = vmatmul.mubr.msk.f32.vlgmr.msra.gmra.mrb[0].mxu0 %vm459_vm5, %v1221_v49 }
 0x3a1   : > { %1304 = vmatprep.mubr.f32.mxu0 %v2159_v21  ;;  %p2086_p13 = pneg %p2085_p12 }
 0x3a3   : > { %p2093_p3 = pnand %p2092_p2, %p2086_p13 }
 0x3a8   : > { %v1654_v32 = vpop.permute.xlu0 %1653  ;;  %v1652_v42 = vpop.permute.xlu1 %1651 }
 0x3a9   : > { %v1656_v23 = vsel %vm1655_vm12, %v1652_v42, %v1654_v32  ;;  %v1657_v46 = vsel %vm1655_vm12, %v1654_v32, %v1652_v42 }
 0x3aa   : > { %v1669_v29 = vsel %vm1667_vm8, %v1657_v46, 0.0  ;;  %v1670_v19 = vsel %vm1668_vm6, %v1656_v23, 0.0 }
 0x3ab   : > { %v1671_v41 = vadd.f32 %v1669_v29, %v1649_v48  ;;  %v1672_v1 = vadd.f32 %v1670_v19, %v1650_v7 }
 0x3b2   : > { %v1674_v45 = vpop.permute.xlu0 %1673  ;;  %v1676_v0 = vpop.permute.xlu1 %1675 }
 0x3b3   : > { %v1678_v11 = vsel %vm1677_vm10, %v1674_v45, %v1676_v0  ;;  %v1679_v13 = vsel %vm1677_vm10, %v1676_v0, %v1674_v45 }
 0x3b4   : > { %v1691_v8 = vsel %vm1689_vm1, %v1678_v11, 0.0  ;;  %v1692_v9 = vsel %vm1690_vm9, %v1679_v13, 0.0 }
 0x3b5   : > { %v1693_v14 = vadd.f32 %v1691_v8, %v1671_v41  ;;  %v1694_v10 = vadd.f32 %v1692_v9, %v1672_v1 }
 0x3b6   : > { %v1223_v15 = vpop.permute.xlu0 %1222  ;;  %v1700_v12 = vpop.permute.xlu1 %1699 }
 0x3b7   : > { %1961 = vmatmul.mubr.msk.f32.gmra.mrb[2].mxu0 %vm459_vm5, %v1223_v15  ;;  %1972 = vmatprep.subr.msk.mxu0 %vm466_vm7, %v1694_v10 }
 0x3b8   : > { %1777 = vmatprep.mubr.f32.mxu0 %v2159_v21  ;;  %1973 = vmatpush1.msk.msra.mxu0 %vm466_vm7, %v1693_v14 }
 0x3ba   : > { %v1702_v5 = vpop.permute.xlu0 %1701 }
 0x3bb   : > { %1974 = vmatmul.mubr.msk.f32.vlgmr.msra.gmra.mrb[0].mxu0 %vm459_vm5, %v1700_v12 }
 0x3bc   : > { %1783 = vmatprep.mubr.f32.mxu0 %v2159_v21 }
 0x3bf   : > { %1975 = vmatmul.mubr.msk.f32.gmra.mrb[2].mxu0 %vm459_vm5, %v1702_v5 }
 0x3c7   : > { %v452_v27 = vpop.permute.xlu1 %451 }
 0x3cb   : > { %v457_v36 = vpop.permute.xlu0 %456 }
 0x460   : > { %v918_v38 = vpop.f32.mrb[0].mxu1 }
 0x461   : > { %v920_v20 = vpop.f32.mrb[1].mxu1  ;;  %v1985_v58 = vadd.f32 %v918_v38, %v452_v27 }
 0x462   : > { %v1991_v60 = vadd.f32 %v920_v20, %v452_v27 }
 0x464   : > { %v924_v63 = vpop.f32.mrb[2].mxu1 }
 0x465   : > { %v926_v61 = vpop.f32.mrb[3].mxu1  ;;  %v1997_v24 = vadd.f32 %v924_v63, %v457_v36 }
 0x466   : > { %v2003_v54 = vadd.f32 %v926_v61, %v457_v36 }
 0x48e   : > { %v1779_v18 = vpop.f32.mrb[0].mxu0 }
 0x48f   : > { %v1988_v30 = vadd.f32 %v1985_v58, %v1779_v18  ;;  %v1781_v35 = vpop.f32.mrb[1].mxu0 }
 0x490   : > { %v1994_v33 = vadd.f32 %v1991_v60, %v1781_v35 }
 0x491   : > { %v1810_v55 = vmul.f32 0.70710677, %v1988_v30  ;;  %v1806_v28 = vmul.f32 0.5, %v1988_v30 }
 0x492   : > { %v1811_v21 = vmul.f32 0.70710677, %v1994_v33  ;;  %v1785_v22 = vpop.f32.mrb[2].mxu0  ;;  %v1807_v16 = vmul.f32 0.5, %v1994_v33 }
 0x493   : > { %2073 = verf.f32 %v1810_v55  ;;  %v2000_v2 = vadd.f32 %v1997_v24, %v1785_v22  ;;  %v1787_v37 = vpop.f32.mrb[3].mxu0 }
 0x494   : > { %2075 = verf.f32 %v1811_v21  ;;  %v2006_v40 = vadd.f32 %v2003_v54, %v1787_v37 }
 0x495   : > { %v1812_v39 = vmul.f32 0.70710677, %v2000_v2  ;;  %v1808_v59 = vmul.f32 0.5, %v2000_v2 }
 0x496   : > { %v1813_v6 = vmul.f32 0.70710677, %v2006_v40  ;;  %v1809_v43 = vmul.f32 0.5, %v2006_v40 }
 0x497   : > { %2077 = verf.f32 %v1812_v39 }
 0x498   : > { %2079 = verf.f32 %v1813_v6 }
 0x49d   : > { %v2074_v31 = vpop.eup %2073 }
 0x49e   : > { %v2076_v26 = vpop.eup %2075  ;;  %v1818_v3 = vadd.f32 1.0, %v2074_v31 }
 0x49f   : > { %v1819_v34 = vadd.f32 1.0, %v2076_v26 }
 0x4a0   : > { %v1822_v53 = vmul.f32 %v1818_v3, %v1806_v28 }
 0x4a1   : > { %v2078_v56 = vpop.eup %2077  ;;  %v1823_v52 = vmul.f32 %v1819_v34, %v1807_v16 }
 0x4a2   : > { %v2080_v44 = vpop.eup %2079  ;;  %v1830_v17 = vmul.f32 %v1826_v62, %v1822_v53  ;;  %v1820_v49 = vadd.f32 1.0, %v2078_v56 }
 0x4a3   : > { %v1831_v57 = vmul.f32 %v1827_v50, %v1823_v52  ;;  %v1821_v32 = vadd.f32 1.0, %v2080_v44 }
 0x4a4   : > { %1834 = vst [vmem:[%s244_s12] sm:$0xff] %v1830_v17  ;;  %v1824_v42 = vmul.f32 %v1820_v49, %v1808_v59 }
 0x4a5   : > { %1835 = vst [vmem:[%s244_s12 + $0x8] sm:$0xff] %v1831_v57  ;;  %v1825_v23 = vmul.f32 %v1821_v32, %v1809_v43 }
 0x4a6   : > { %v1832_v46 = vmul.f32 %v1828_v47, %v1824_v42 }
 0x4a7   : > { %v1833_v51 = vmul.f32 %v1829_v4, %v1825_v23 }
 0x4a8   : > { %1836 = vst [vmem:[%s244_s12 + $0x10] sm:$0xff] %v1832_v46 }
 0x4a9   : > { %1837 = vst [vmem:[%s244_s12 + $0x18] sm:$0xff] %v1833_v51 }
 0x4aa   : > { %2096 = shalt.err (!%p2093_p3)
}
 0x4ab   : > { %s2097_s18 = scalar_lea.hbm %s3169_s16, 512  ;;  %s2101_s26 = scalar_lea.hbm %s3223_s6, 1024 }
 0x4ac   : > { %p2098_p4 = scmp.ne.s32.totalorder %s3169_s16, %s2097_s18  ;;  %p2102_p9 = scmp.lt.u32.totalorder %s3169_s16, %s3223_s6 }
 0x4ad   : > { %p2103_p10 = scmp.lt.u32.totalorder %s2101_s26, %s2097_s18  ;;  %p2105_p12 = scmp.lt.u32.totalorder %s2097_s18, %s3169_s16 }
 0x4ae   : > { %p2099_p7 = pnand %p2098_p4, %p2238_p5 }
 0x4af   : > { %p2104_p11 = por %p2103_p10, %p2102_p9 }
 0x4b0   : > { %p2100_p8 = pneg %p2099_p7 }
 0x4b1   : > { %p2106_p13 = por %p2105_p12, %p2104_p11 }
 0x4b3   : > { %p2107_p0 = pnand %p2106_p13, %p2100_p8 }
 0x4b5   : > { %2110 = shalt.err (!%p2107_p0)
}
 0x4b6   : > { %s2164_s20 = smov 256  }
 0x4b7   : > { %2015 = dma.vmem_to_hbm [thread:$0]  (%p2238_p5), %s3171_s28, 512, %s3169_s16, %s3175_s25, %s2164_s20, %s2164_s20, %s2148_s14  }
 0x4b8 PF: > { %p2021_p1 = scmp.ge.s32.totalorder %s2145_s24, 2  ;;  %s1867_s29 = sand.u32 1, %s2133_s21  }
 0x4b9   : > { %s1868_s13 = scalar_lea.sflag [#allocation3], %s1867_s29 }
 0x4ba   : > { %p2018_p2 = pnand %p2021_p1, %p2242_p6 }
 0x4bc   : > { %2128 = dma.done.wait (!%p2018_p2), %s1868_s13, 512  }
 0x4bd   : > { %2130 = vsyncadd (!%p2018_p2), %s1868_s13, 4294966784  ;;  %p16_p3 = scmp.ge.s32.totalorder %s2225_s27, 4   ;;  %s3261_s21 = smov %s2137_s22 }
 0x4be   : > { %s3262_s22 = smov %s2141_s23  ;;  %s3263_s23 = smov %s2236_s30 }
 0x4bf   : > { %s3264_s24 = smov %s2225_s27  ;;  %18 = sbr.rel (!%p16_p3) target bundleno = 3 (0x3), region = 118 }
 0x4c6   :  { %1873 = vsyncpa [#allocation3], 1 }
 0x4c7   :  { %1875 = vsyncpa [#allocation3 + $0x1], 1 }

</bundles_post_ra>
